<compile_context>
chip_gen: v6e
topology: v6e:2x2x1
jax: 0.10.0
libtpu: 0.0.40
codegen_flags: <defaults>
</compile_context>

<pallas_src>
import functools

import jax
import jax.numpy as jnp
from jax import lax
from jax.experimental import pallas as pl
from jax.experimental.pallas import tpu as pltpu


def _round_up(x, m):
    return ((x + m - 1) // m) * m


def _vmem_block_bytes(shape, dtype):
    """Rough padded VMEM footprint of one buffer (last dim -> 128 lanes,
    second-to-last -> sublane tile)."""
    item = jnp.dtype(dtype).itemsize
    sublane = max(8, 32 // item)
    dims = [1, 1] + list(shape)
    dims[-1] = _round_up(dims[-1], 128)
    dims[-2] = _round_up(dims[-2], sublane)
    n = 1
    for d in dims:
        n *= d
    return n * item


# --------------------------------------------------------------------------
# Fused kernel: temporal conv (+folded BN +ReLU) -> spatial conv, per batch n.
# --------------------------------------------------------------------------
def conv2plus1d_kernel(T, H, x_ref, wt_ref, bt_ref, wxy_ref, bxy_ref, o_ref,
                       xpad_ref, ypad_ref):
    # Packed lane-dense layout: rows = (t, h), lanes = (w, channel).
    #   x_ref   : (1, T*H, W*Cin)       bf16
    #   wt_ref  : (kt, W*Cin, W*Cmid)   bf16  block-diagonal temporal taps (BN folded)
    #   bt_ref  : (1, W*Cmid)           f32   folded bias, tiled over W
    #   wxy_ref : (kh, W*Cmid, W*Cout)  bf16  block-banded spatial taps (W halo baked in)
    #   bxy_ref : (1, W*Cout)           f32
    #   o_ref   : (1, T*H, W*Cout)      f32
    #   xpad_ref: ((T+2*pt)*H, W*Cin)   bf16  scratch: zero guard frames (T halo)
    #   ypad_ref: (T, H+2*ph, W*Cmid)   bf16  scratch: zero guard rows  (H halo)
    WCin = x_ref.shape[2]
    kt, _, WCmid = wt_ref.shape
    kh, _, WCout = wxy_ref.shape
    pt, ph = kt // 2, kh // 2

    # ---------------- stage 1: temporal conv + folded BN + ReLU -------------
    if pt > 0:                               # zero T-halo guard frames
        zf = jnp.zeros((pt * H, WCin), jnp.bfloat16)
        xpad_ref[0:pt * H, :] = zf
        xpad_ref[(pt + T) * H:(2 * pt + T) * H, :] = zf
    xpad_ref[pt * H:(pt + T) * H, :] = x_ref[0]

    acc1 = jnp.zeros((T * H, WCmid), jnp.float32)
    for dt in range(kt):                     # static unroll; aligned row slices
        acc1 = acc1 + jnp.dot(xpad_ref[dt * H:(dt + T) * H, :], wt_ref[dt],
                              preferred_element_type=jnp.float32)
    y1 = jnp.maximum(acc1 + bt_ref[...], 0.0)          # f32; never leaves VMEM

    # ---------------- stage 2: spatial conv on the resident intermediate ----
    if ph > 0:                               # zero H-halo guard rows
        zr = jnp.zeros((T, ph, WCmid), jnp.bfloat16)
        ypad_ref[:, 0:ph, :] = zr
        ypad_ref[:, ph + H:2 * ph + H, :] = zr
    ypad_ref[:, ph:ph + H, :] = y1.reshape(T, H, WCmid).astype(jnp.bfloat16)

    acc2 = jnp.zeros((T * H, WCout), jnp.float32)
    for dh in range(kh):                     # static unroll over height taps
        win = ypad_ref[:, dh:dh + H, :].reshape(T * H, WCmid)
        acc2 = acc2 + jnp.dot(win, wxy_ref[dh],
                              preferred_element_type=jnp.float32)
    o_ref[0] = acc2 + bxy_ref[...]           # lane-dense (T*H, W*Cout) store


# --------------------------------------------------------------------------
# Wrapper: Conv2plus1d forward (conv_xy_first = False), eval-mode BatchNorm.
# --------------------------------------------------------------------------
def conv2plus1d_forward(x, wt, bt, gamma, beta, rmean, rvar, wxy, bxy,
                        eps=1e-5):
    N, Cin, T, H, W = x.shape
    Cmid, _, kt, _, _ = wt.shape
    Cout, _, _, kh, kw = wxy.shape
    pt, ph, pw = kt // 2, kh // 2, kw // 2
    WCin, WCmid, WCout = W * Cin, W * Cmid, W * Cout

    # Lane-dense input packing (rows (t,h), lanes (w,cin)), bf16 for the DMA/MXU.
    # NOTE: adjacent layers could keep this packed layout and skip both
    # transposes; they are kept here only to honor the NCTHW interface.
    x_packed = jnp.transpose(x, (0, 2, 3, 4, 1)).reshape(N, T * H, WCin)
    x_packed = x_packed.astype(jnp.bfloat16)

    # Fold eval-mode BatchNorm into the temporal conv weight / bias.
    scale = gamma / jnp.sqrt(rvar + eps)                          # (Cmid,)
    w_t = jnp.transpose(wt[:, :, :, 0, 0], (2, 1, 0)) * scale     # (kt, Cin, Cmid)
    b_t = bt * scale + beta - rmean * scale                       # (Cmid,)

    # Temporal taps, block-diagonal over W: (w_in,cin) x (w_out,cmid).
    eye_w = jnp.eye(W, dtype=jnp.float32)
    wt_bd = jnp.einsum('vw,tio->tviwo', eye_w, w_t).reshape(kt, WCin, WCmid)
    bt_bd = jnp.tile(b_t, W).reshape(1, WCmid)

    # Spatial taps, block-banded over W (width halo baked into the zeros).
    w_xy = jnp.transpose(wxy[:, :, 0, :, :], (2, 3, 1, 0))        # (kh, kw, Cmid, Cout)
    bands = jnp.stack([jnp.eye(W, k=pw - dw, dtype=jnp.float32)
                       for dw in range(kw)])                      # (kw, W, W)
    wxy_bd = jnp.einsum('dvw,hdio->hviwo', bands, w_xy).reshape(kh, WCmid, WCout)
    bxy_bd = jnp.tile(bxy, W).reshape(1, WCout)

    wt_bd = wt_bd.astype(jnp.bfloat16)
    wxy_bd = wxy_bd.astype(jnp.bfloat16)

    # VMEM budget from actual block bytes (double-buffered ins/outs + scratch
    # + f32 transients), clamped; for v7x (64 MiB) keep the cap at 64 MiB.
    est = (2 * _vmem_block_bytes((1, T * H, WCin), jnp.bfloat16)
           + 2 * _vmem_block_bytes((1, T * H, WCout), jnp.float32)
           + 2 * _vmem_block_bytes((kt, WCin, WCmid), jnp.bfloat16)
           + 2 * _vmem_block_bytes((kh, WCmid, WCout), jnp.bfloat16)
           + _vmem_block_bytes(((T + 2 * pt) * H, WCin), jnp.bfloat16)
           + _vmem_block_bytes((T, H + 2 * ph, WCmid), jnp.bfloat16)
           + 6 * _vmem_block_bytes((T * H, WCmid), jnp.float32))
    vmem_limit = int(min(64 * 2 ** 20, max(32 * 2 ** 20, 2 * est)))

    kernel = functools.partial(conv2plus1d_kernel, T, H)
    y = pl.pallas_call(
        kernel,
        out_shape=jax.ShapeDtypeStruct((N, T * H, WCout), jnp.float32),
        grid_spec=pltpu.PrefetchScalarGridSpec(
            num_scalar_prefetch=0,
            grid=(N,),
            in_specs=[
                pl.BlockSpec((1, T * H, WCin), lambda n: (n, 0, 0)),
                pl.BlockSpec((kt, WCin, WCmid), lambda n: (0, 0, 0)),
                pl.BlockSpec((1, WCmid), lambda n: (0, 0)),
                pl.BlockSpec((kh, WCmid, WCout), lambda n: (0, 0, 0)),
                pl.BlockSpec((1, WCout), lambda n: (0, 0)),
            ],
            out_specs=pl.BlockSpec((1, T * H, WCout), lambda n: (n, 0, 0)),
            scratch_shapes=[
                pltpu.VMEM(((T + 2 * pt) * H, WCin), jnp.bfloat16),
                pltpu.VMEM((T, H + 2 * ph, WCmid), jnp.bfloat16),
            ],
        ),
        compiler_params=pltpu.CompilerParams(
            dimension_semantics=("parallel",),
            vmem_limit_bytes=vmem_limit),
    )(x_packed, wt_bd, bt_bd, wxy_bd, bxy_bd)

    # Unpack lane-dense output -> PyTorch NCTHW layout.
    return jnp.transpose(y.reshape(N, T, H, W, Cout), (0, 4, 1, 2, 3))


# --------------------------------------------------------------------------
# Pure-JAX reference (lax conv, f32 HIGHEST) for the correctness check.
# --------------------------------------------------------------------------
def _conv3d_nchw(x, w, b, padding):
    dn = jax.lax.conv_dimension_numbers(x.shape, w.shape,
                                        ("NCDHW", "OIDHW", "NCDHW"))
    y = lax.conv_general_dilated(
        x, w, window_strides=(1, 1, 1), padding=padding,
        dimension_numbers=dn, precision=lax.Precision.HIGHEST)
    return y + b[None, :, None, None, None]


def reference_forward(x, wt, bt, gamma, beta, rmean, rvar, wxy, bxy, eps=1e-5):
    y = _conv3d_nchw(x, wt, bt, ((1, 1), (0, 0), (0, 0)))
    inv_std = gamma / jnp.sqrt(rvar + eps)
    y = (y - rmean[None, :, None, None, None]) * inv_std[None, :, None, None, None] \
        + beta[None, :, None, None, None]
    y = jnp.maximum(y, 0.0)
    return _conv3d_nchw(y, wxy, bxy, ((0, 0), (1, 1), (1, 1)))


if __name__ == "__main__":
    N, Cin, T, H, W = 2, 4, 8, 16, 16
    Cmid, Cout = 16, 8
    kt, kh, kw = 3, 3, 3

    keys = jax.random.split(jax.random.PRNGKey(0), 9)
    x = jax.random.normal(keys[0], (N, Cin, T, H, W), jnp.float32)
    wt = 0.2 * jax.random.normal(keys[1], (Cmid, Cin, kt, 1, 1), jnp.float32)
    bt = 0.1 * jax.random.normal(keys[2], (Cmid,), jnp.float32)
    wxy = 0.2 * jax.random.normal(keys[3], (Cout, Cmid, 1, kh, kw), jnp.float32)
    bxy = 0.1 * jax.random.normal(keys[4], (Cout,), jnp.float32)
    gamma = 1.0 + 0.1 * jax.random.normal(keys[5], (Cmid,), jnp.float32)
    beta = 0.1 * jax.random.normal(keys[6], (Cmid,), jnp.float32)
    rmean = 0.1 * jax.random.normal(keys[7], (Cmid,), jnp.float32)
    rvar = 0.5 + jnp.abs(0.5 * jax.random.normal(keys[8], (Cmid,), jnp.float32))

    out = conv2plus1d_forward(x, wt, bt, gamma, beta, rmean, rvar, wxy, bxy)
    out = jax.block_until_ready(out)
    assert out.shape == (N, Cout, T, H, W), out.shape

    ref = reference_forward(x, wt, bt, gamma, beta, rmean, rvar, wxy, bxy)
    max_abs = float(jnp.max(jnp.abs(out - ref)))
    rel = float(jnp.linalg.norm((out - ref).ravel())
                / jnp.linalg.norm(ref.ravel()))
    # Kernel uses bf16 MXU operands with f32 accumulation (reference is f32
    # HIGHEST): loose absolute tolerance, tight relative-Frobenius tolerance
    # (catches structural/halo bugs, tolerates bf16 rounding).
    assert max_abs < 1e-1, f"max abs error {max_abs}"
    assert rel < 1.5e-2, f"relative error {rel}"

    print("KERNEL_OK")
</pallas_src>

<mosaic_0001>
module attributes {stable_mosaic.version = 11 : i64} {
  func.func @conv2plus1d_kernel(%arg0: i32, %arg1: memref<1x128x64xbf16, #tpu.memory_space<vmem>>, %arg2: memref<3x64x256xbf16, #tpu.memory_space<vmem>>, %arg3: memref<1x256xf32, #tpu.memory_space<vmem>>, %arg4: memref<3x256x128xbf16, #tpu.memory_space<vmem>>, %arg5: memref<1x128xf32, #tpu.memory_space<vmem>>, %arg6: memref<1x128x128xf32, #tpu.memory_space<vmem>>, %arg7: memref<160x64xbf16, #tpu.memory_space<vmem>>, %arg8: memref<8x18x256xbf16, #tpu.memory_space<vmem>>) attributes {dimension_semantics = [#tpu.dimension_semantics<parallel>], iteration_bounds = array<i64: 2>, scalar_prefetch = 0 : i64, scratch_operands = 2 : i64, tpu.core_type = #tpu.core_type<tc>, window_params = [{transform_indices = @transform_0, window_bounds = array<i64: 1, 128, 64>}, {pipeline_mode = #tpu.pipeline_mode<synchronous>, transform_indices = @transform_1, window_bounds = array<i64: 3, 64, 256>}, {pipeline_mode = #tpu.pipeline_mode<synchronous>, transform_indices = @transform_2, window_bounds = array<i64: 1, 256>}, {pipeline_mode = #tpu.pipeline_mode<synchronous>, transform_indices = @transform_3, window_bounds = array<i64: 3, 256, 128>}, {pipeline_mode = #tpu.pipeline_mode<synchronous>, transform_indices = @transform_4, window_bounds = array<i64: 1, 128>}, {transform_indices = @transform_5, window_bounds = array<i64: 1, 128, 128>}]} {
    %cst = arith.constant 0.000000e+00 : bf16
    %0 = vector.broadcast %cst : bf16 to vector<16x64xbf16>
    %c0 = arith.constant 0 : index
    %c0_0 = arith.constant 0 : index
    %1 = vector.load %arg7[%c0, %c0_0] : memref<160x64xbf16, #tpu.memory_space<vmem>>, vector<16x64xbf16>
    tpu.vector_store %arg7[%c0, %c0_0], %0 {strides = array<i32>} : memref<160x64xbf16, #tpu.memory_space<vmem>>, vector<16x64xbf16>,
    %c144 = arith.constant 144 : index
    %c0_1 = arith.constant 0 : index
    %2 = vector.load %arg7[%c144, %c0_1] : memref<160x64xbf16, #tpu.memory_space<vmem>>, vector<16x64xbf16>
    tpu.vector_store %arg7[%c144, %c0_1], %0 {strides = array<i32>} : memref<160x64xbf16, #tpu.memory_space<vmem>>, vector<16x64xbf16>,
    %c0_2 = arith.constant 0 : index
    %c0_3 = arith.constant 0 : index
    %c0_4 = arith.constant 0 : index
    %3 = vector.load %arg1[%c0_2, %c0_3, %c0_4] : memref<1x128x64xbf16, #tpu.memory_space<vmem>>, vector<1x128x64xbf16>
    %4 = vector.shape_cast %3 : vector<1x128x64xbf16> to vector<128x64xbf16>
    %c16 = arith.constant 16 : index
    %c0_5 = arith.constant 0 : index
    %5 = vector.load %arg7[%c16, %c0_5] : memref<160x64xbf16, #tpu.memory_space<vmem>>, vector<128x64xbf16>
    tpu.vector_store %arg7[%c16, %c0_5], %4 {strides = array<i32>} : memref<160x64xbf16, #tpu.memory_space<vmem>>, vector<128x64xbf16>,
    %cst_6 = arith.constant 0.000000e+00 : f32
    %6 = vector.broadcast %cst_6 : f32 to vector<128x256xf32>
    %c0_7 = arith.constant 0 : index
    %c0_8 = arith.constant 0 : index
    %7 = vector.load %arg7[%c0_7, %c0_8] : memref<160x64xbf16, #tpu.memory_space<vmem>>, vector<128x64xbf16>
    %c0_9 = arith.constant 0 : index
    %c0_10 = arith.constant 0 : index
    %c0_11 = arith.constant 0 : index
    %8 = vector.load %arg2[%c0_9, %c0_10, %c0_11] : memref<3x64x256xbf16, #tpu.memory_space<vmem>>, vector<1x64x256xbf16>
    %9 = vector.shape_cast %8 : vector<1x64x256xbf16> to vector<64x256xbf16>
    %cst_12 = arith.constant dense<0.000000e+00> : vector<128x256xf32>
    %10 = tpu.matmul %7, %9, %cst_12 {dimension_numbers = #tpu.dot_dimension_numbers<[1], [0], [0], [1], [0, 0, 1, 1], [], []>} : vector<128x64xbf16>, vector<64x256xbf16>, vector<128x256xf32> -> vector<128x256xf32>
    %11 = arith.addf %6, %10 : vector<128x256xf32>
    %c16_13 = arith.constant 16 : index
    %c0_14 = arith.constant 0 : index
    %12 = vector.load %arg7[%c16_13, %c0_14] : memref<160x64xbf16, #tpu.memory_space<vmem>>, vector<128x64xbf16>
    %c1 = arith.constant 1 : index
    %c0_15 = arith.constant 0 : index
    %c0_16 = arith.constant 0 : index
    %13 = vector.load %arg2[%c1, %c0_15, %c0_16] : memref<3x64x256xbf16, #tpu.memory_space<vmem>>, vector<1x64x256xbf16>
    %14 = vector.shape_cast %13 : vector<1x64x256xbf16> to vector<64x256xbf16>
    %cst_17 = arith.constant dense<0.000000e+00> : vector<128x256xf32>
    %15 = tpu.matmul %12, %14, %cst_17 {dimension_numbers = #tpu.dot_dimension_numbers<[1], [0], [0], [1], [0, 0, 1, 1], [], []>} : vector<128x64xbf16>, vector<64x256xbf16>, vector<128x256xf32> -> vector<128x256xf32>
    %16 = arith.addf %11, %15 : vector<128x256xf32>
    %c32 = arith.constant 32 : index
    %c0_18 = arith.constant 0 : index
    %17 = vector.load %arg7[%c32, %c0_18] : memref<160x64xbf16, #tpu.memory_space<vmem>>, vector<128x64xbf16>
    %c2 = arith.constant 2 : index
    %c0_19 = arith.constant 0 : index
    %c0_20 = arith.constant 0 : index
    %18 = vector.load %arg2[%c2, %c0_19, %c0_20] : memref<3x64x256xbf16, #tpu.memory_space<vmem>>, vector<1x64x256xbf16>
    %19 = vector.shape_cast %18 : vector<1x64x256xbf16> to vector<64x256xbf16>
    %cst_21 = arith.constant dense<0.000000e+00> : vector<128x256xf32>
    %20 = tpu.matmul %17, %19, %cst_21 {dimension_numbers = #tpu.dot_dimension_numbers<[1], [0], [0], [1], [0, 0, 1, 1], [], []>} : vector<128x64xbf16>, vector<64x256xbf16>, vector<128x256xf32> -> vector<128x256xf32>
    %21 = arith.addf %16, %20 : vector<128x256xf32>
    %c0_22 = arith.constant 0 : index
    %c0_23 = arith.constant 0 : index
    %22 = vector.load %arg3[%c0_22, %c0_23] : memref<1x256xf32, #tpu.memory_space<vmem>>, vector<1x256xf32>
    %23 = vector.broadcast %22 : vector<1x256xf32> to vector<128x256xf32>
    %24 = arith.addf %21, %23 : vector<128x256xf32>
    %cst_24 = arith.constant 0.000000e+00 : f32
    %25 = vector.broadcast %cst_24 : f32 to vector<128x256xf32>
    %26 = arith.maximumf %24, %25 : vector<128x256xf32>
    %cst_25 = arith.constant 0.000000e+00 : bf16
    %27 = vector.broadcast %cst_25 : bf16 to vector<8x1x256xbf16>
    %c0_26 = arith.constant 0 : index
    %c0_27 = arith.constant 0 : index
    %c0_28 = arith.constant 0 : index
    %28 = vector.load %arg8[%c0_26, %c0_27, %c0_28] : memref<8x18x256xbf16, #tpu.memory_space<vmem>>, vector<8x1x256xbf16>
    tpu.vector_store %arg8[%c0_26, %c0_27, %c0_28], %27 {strides = array<i32>} : memref<8x18x256xbf16, #tpu.memory_space<vmem>>, vector<8x1x256xbf16>,
    %c0_29 = arith.constant 0 : index
    %c17 = arith.constant 17 : index
    %c0_30 = arith.constant 0 : index
    %29 = vector.load %arg8[%c0_29, %c17, %c0_30] : memref<8x18x256xbf16, #tpu.memory_space<vmem>>, vector<8x1x256xbf16>
    tpu.vector_store %arg8[%c0_29, %c17, %c0_30], %27 {strides = array<i32>} : memref<8x18x256xbf16, #tpu.memory_space<vmem>>, vector<8x1x256xbf16>,
    %30 = vector.shape_cast %26 : vector<128x256xf32> to vector<8x16x256xf32>
    %31 = arith.truncf %30 : vector<8x16x256xf32> to vector<8x16x256xbf16>
    %c0_31 = arith.constant 0 : index
    %c1_32 = arith.constant 1 : index
    %c0_33 = arith.constant 0 : index
    %32 = vector.load %arg8[%c0_31, %c1_32, %c0_33] : memref<8x18x256xbf16, #tpu.memory_space<vmem>>, vector<8x16x256xbf16>
    tpu.vector_store %arg8[%c0_31, %c1_32, %c0_33], %31 {strides = array<i32>} : memref<8x18x256xbf16, #tpu.memory_space<vmem>>, vector<8x16x256xbf16>,
    %cst_34 = arith.constant 0.000000e+00 : f32
    %33 = vector.broadcast %cst_34 : f32 to vector<128x128xf32>
    %c0_35 = arith.constant 0 : index
    %c0_36 = arith.constant 0 : index
    %c0_37 = arith.constant 0 : index
    %34 = vector.load %arg8[%c0_35, %c0_36, %c0_37] : memref<8x18x256xbf16, #tpu.memory_space<vmem>>, vector<8x16x256xbf16>
    %35 = vector.shape_cast %34 : vector<8x16x256xbf16> to vector<128x256xbf16>
    %c0_38 = arith.constant 0 : index
    %c0_39 = arith.constant 0 : index
    %c0_40 = arith.constant 0 : index
    %36 = vector.load %arg4[%c0_38, %c0_39, %c0_40] : memref<3x256x128xbf16, #tpu.memory_space<vmem>>, vector<1x256x128xbf16>
    %37 = vector.shape_cast %36 : vector<1x256x128xbf16> to vector<256x128xbf16>
    %cst_41 = arith.constant dense<0.000000e+00> : vector<128x128xf32>
    %38 = tpu.matmul %35, %37, %cst_41 {dimension_numbers = #tpu.dot_dimension_numbers<[1], [0], [0], [1], [0, 0, 1, 1], [], []>} : vector<128x256xbf16>, vector<256x128xbf16>, vector<128x128xf32> -> vector<128x128xf32>
    %39 = arith.addf %33, %38 : vector<128x128xf32>
    %c0_42 = arith.constant 0 : index
    %c1_43 = arith.constant 1 : index
    %c0_44 = arith.constant 0 : index
    %40 = vector.load %arg8[%c0_42, %c1_43, %c0_44] : memref<8x18x256xbf16, #tpu.memory_space<vmem>>, vector<8x16x256xbf16>
    %41 = vector.shape_cast %40 : vector<8x16x256xbf16> to vector<128x256xbf16>
    %c1_45 = arith.constant 1 : index
    %c0_46 = arith.constant 0 : index
    %c0_47 = arith.constant 0 : index
    %42 = vector.load %arg4[%c1_45, %c0_46, %c0_47] : memref<3x256x128xbf16, #tpu.memory_space<vmem>>, vector<1x256x128xbf16>
    %43 = vector.shape_cast %42 : vector<1x256x128xbf16> to vector<256x128xbf16>
    %cst_48 = arith.constant dense<0.000000e+00> : vector<128x128xf32>
    %44 = tpu.matmul %41, %43, %cst_48 {dimension_numbers = #tpu.dot_dimension_numbers<[1], [0], [0], [1], [0, 0, 1, 1], [], []>} : vector<128x256xbf16>, vector<256x128xbf16>, vector<128x128xf32> -> vector<128x128xf32>
    %45 = arith.addf %39, %44 : vector<128x128xf32>
    %c0_49 = arith.constant 0 : index
    %c2_50 = arith.constant 2 : index
    %c0_51 = arith.constant 0 : index
    %46 = vector.load %arg8[%c0_49, %c2_50, %c0_51] : memref<8x18x256xbf16, #tpu.memory_space<vmem>>, vector<8x16x256xbf16>
    %47 = vector.shape_cast %46 : vector<8x16x256xbf16> to vector<128x256xbf16>
    %c2_52 = arith.constant 2 : index
    %c0_53 = arith.constant 0 : index
    %c0_54 = arith.constant 0 : index
    %48 = vector.load %arg4[%c2_52, %c0_53, %c0_54] : memref<3x256x128xbf16, #tpu.memory_space<vmem>>, vector<1x256x128xbf16>
    %49 = vector.shape_cast %48 : vector<1x256x128xbf16> to vector<256x128xbf16>
    %cst_55 = arith.constant dense<0.000000e+00> : vector<128x128xf32>
    %50 = tpu.matmul %47, %49, %cst_55 {dimension_numbers = #tpu.dot_dimension_numbers<[1], [0], [0], [1], [0, 0, 1, 1], [], []>} : vector<128x256xbf16>, vector<256x128xbf16>, vector<128x128xf32> -> vector<128x128xf32>
    %51 = arith.addf %45, %50 : vector<128x128xf32>
    %c0_56 = arith.constant 0 : index
    %c0_57 = arith.constant 0 : index
    %52 = vector.load %arg5[%c0_56, %c0_57] : memref<1x128xf32, #tpu.memory_space<vmem>>, vector<1x128xf32>
    %53 = vector.broadcast %52 : vector<1x128xf32> to vector<128x128xf32>
    %54 = arith.addf %51, %53 : vector<128x128xf32>
    %c0_58 = arith.constant 0 : index
    %c0_59 = arith.constant 0 : index
    %c0_60 = arith.constant 0 : index
    %55 = vector.load %arg6[%c0_58, %c0_59, %c0_60] : memref<1x128x128xf32, #tpu.memory_space<vmem>>, vector<1x128x128xf32>
    %56 = vector.shape_cast %55 : vector<1x128x128xf32> to vector<128x128xf32>
    %57 = vector.shape_cast %54 : vector<128x128xf32> to vector<1x128x128xf32>
    tpu.vector_store %arg6[%c0_58, %c0_59, %c0_60], %57 {strides = array<i32>} : memref<1x128x128xf32, #tpu.memory_space<vmem>>, vector<1x128x128xf32>,
    return
  }
  func.func @transform_0(%arg0: i32) -> (i32, i32, i32) {
    %c0_i32 = arith.constant 0 : i32
    %c0_i32_0 = arith.constant 0 : i32
    %c0_i32_1 = arith.constant 0 : i32
    return %arg0, %c0_i32, %c0_i32_0 : i32, i32, i32
  }
  func.func @transform_1(%arg0: i32) -> (i32, i32, i32) {
    %c0_i32 = arith.constant 0 : i32
    %c0_i32_0 = arith.constant 0 : i32
    %c0_i32_1 = arith.constant 0 : i32
    %c0_i32_2 = arith.constant 0 : i32
    return %c0_i32, %c0_i32_0, %c0_i32_1 : i32, i32, i32
  }
  func.func @transform_2(%arg0: i32) -> (i32, i32) {
    %c0_i32 = arith.constant 0 : i32
    %c0_i32_0 = arith.constant 0 : i32
    %c0_i32_1 = arith.constant 0 : i32
    return %c0_i32, %c0_i32_0 : i32, i32
  }
  func.func @transform_3(%arg0: i32) -> (i32, i32, i32) {
    %c0_i32 = arith.constant 0 : i32
    %c0_i32_0 = arith.constant 0 : i32
    %c0_i32_1 = arith.constant 0 : i32
    %c0_i32_2 = arith.constant 0 : i32
    return %c0_i32, %c0_i32_0, %c0_i32_1 : i32, i32, i32
  }
  func.func @transform_4(%arg0: i32) -> (i32, i32) {
    %c0_i32 = arith.constant 0 : i32
    %c0_i32_0 = arith.constant 0 : i32
    %c0_i32_1 = arith.constant 0 : i32
    return %c0_i32, %c0_i32_0 : i32, i32
  }
  func.func @transform_5(%arg0: i32) -> (i32, i32, i32) {
    %c0_i32 = arith.constant 0 : i32
    %c0_i32_0 = arith.constant 0 : i32
    %c0_i32_1 = arith.constant 0 : i32
    return %arg0, %c0_i32, %c0_i32_0 : i32, i32, i32
  }
}

</mosaic_0001>

<bundles_post_ra>
// kernel: tpu_custom_call.1
= control target key start
LH: loop header
LB: loop body
LE: loop exit
PB: predicated region body
PF: predicated region fallthrough
CT: control target
= control target key end

     0   :  { %10 = vsyncpa [#allocation5], 0  ;;  %s4522_s0 = inlined_call_operand.vmem [shape: bf16[2,128,64], index: 0, kind: input, shape index: {}]   ;;  %s4523_s1 = inlined_call_operand.vmem [shape: bf16[3,64,256], index: 1, kind: input, shape index: {}]   ;;  %s4524_s2 = inlined_call_operand.vmem [shape: f32[1,256], index: 2, kind: input, shape index: {}]   ;;  %s4525_s3 = inlined_call_operand.hbm [shape: bf16[3,256,128], index: 3, kind: input, shape index: {}]   ;;  %s4526_s4 = inlined_call_operand.vmem [shape: f32[1,128], index: 4, kind: input, shape index: {}]   ;;  %s4527_s5 = inlined_call_operand.hbm [shape: f32[2,128,128], index: 5, kind: output, shape index: {}]  }
   0x1   :  { %11 = vsyncpa [#allocation6], 0 }
   0x2   :  { %13 = vsyncpa [#allocation6 + $0x1], 0  ;;  %s3444_s18 = smov 0   ;;  %s3446_s19 = smov 0  }
   0x3   :  { %s3448_s20 = smov 0   ;;  %s3450_s21 = smov 0  }
   0x4 LB: > { %s3465_s22 = sadd.s32 4294967295, %s3405_s21   ;;  %s2733_s23 = sadd.s32 4294967294, %s3405_s21   ;;  %s3405_s21 = sphi %s3450_s21, %s4575_s21   ;;  %s3401_s20 = sphi %s3448_s20, %s4574_s20   ;;  %s3397_s19 = sphi %s3446_s19, %s4573_s19   ;;  %s3393_s18 = sphi %s3444_s18, %s4572_s18  }
   0x5   : > { %s3469_s24 = sadd.s32 1, %s3405_s21   ;;  %s136_s25 = sadd.s32 1, %s3401_s20 }
   0x6   : > { %s133_s26 = ssub.s32 %s3405_s21, %s3469_s24  ;;  %p146_p0 = scmp.ne.s32.totalorder %s3401_s20, %s3397_s19 }
   0x7   : > { %p134_p1 = scmp.eq.s32.totalorder %s133_s26, 0  ;;  %p147_p2 = scmp.eq.s32.totalorder %s3465_s22, 1 }
   0x8   : > { %p152_p3 = scmp.ne.s32.totalorder %s3397_s19, %s3393_s18  ;;  %p153_p4 = scmp.eq.s32.totalorder %s2733_s23, 1 }
   0x9   : > { %s3480_s27 = scalar_select %p134_p1, %s3401_s20, %s136_s25  }
   0xa   : > { %p3482_p5 = por %p147_p2, %p146_p0  ;;  %p3486_p6 = por %p153_p4, %p152_p3 }
   0xb   : > { %p2734_p7 = scmp.ge.s32.totalorder %s3405_s21, 1  ;;  %p160_p8 = scmp.lt.s32.totalorder %s3405_s21, 3 }
   0xc   : > { %s4533_s29 = scalar_select %p3486_p6, 1, 0 }
   0xd   : > { %p3173_p9 = scmp.eq.s32.totalorder %s3465_s22, 0  ;;  %p3493_p10 = pnand %p2734_p7, %p160_p8 }
   0xe   : > { %s3407_s6 = smov [#allocation4]  }
   0xf   : > { %s178_s7 = sshll.u32 %s3407_s6, 4  ;;  %p3165_p11 = pneg %p3493_p10  ;;  %s179_s7 = int_to_ptr.vmem [resolvable:$true] %s178_s7 }
  0x10   : > { %s3326_s8 = scalar_lea.vmem %s179_s7, 6144  ;;  %p3334_p3 = scmp.lt.s32.totalorder %s179_s7, %s179_s7 }
  0x11   : > { %p3166_p12 = pnand %p3173_p9, %p3165_p11  ;;  %p3327_p0 = scmp.ne.s32.totalorder %s179_s7, %s3326_s8 }
  0x12   : > { %p3335_p4 = scmp.lt.s32.totalorder %s3326_s8, %s3326_s8 }
  0x13   : > { %p3317_p13 = pneg %p3166_p12 }
  0x14   : > { %p3336_p6 = por %p3335_p4, %p3334_p3 }
  0x15   : > { %p3329_p1 = pnand %p3327_p0, %p3317_p13 }
  0x17   : > { %p3330_p2 = pneg %p3329_p1 }
  0x19   : > { %p3337_p7 = pnand %p3336_p6, %p3330_p2 }
  0x1b   : > { %3340 = shalt.err (!%p3337_p7)
}
  0x1c   : > { %s3408_s9 = smov 64   ;;  %s3409_s10 = smov 4  }
  0x1d   : > { %3168 = dma.hbm_to_vmem [thread:$0]  (!%p3166_p12), %s4525_s3, 6144, %s179_s7, [#allocation5], %s3408_s9, %s3408_s9, %s3409_s10  }
  0x1e   : > { %205 = sbr.rel (%p3493_p10) target bundleno = 716 (0x2cc), region = 40 }
  0x23   : > { %3384 = dma.done.wait (%p3173_p9), [#allocation5], 6144  }
  0x24   : > { %3386 = vsyncadd (%p3173_p9), [#allocation5], 4294961152  ;;  %vm239_vm0 = vcmask 519168   ;;  %v3410_v0 = vmov 0   ;;  %p233_p6 = scmp.lt.s32.totalorder %s3465_s22, 1  ;;  %vm391_vm1 = vcmask 523264  }
  0x25   : > { %448 = vmatprep.mubr.bf16.mxu0 %v3410_v0  ;;  %609 = vmatprep.mubr.bf16.mxu1 %v3410_v0  ;;  %240 = vst.msk [vmem:[#allocation2] sm:$0xf] %vm239_vm0, %v3410_v0  ;;  %241 = vst.msk [vmem:[#allocation2 + $0x4] sm:$0xf] %vm239_vm0, %v3410_v0  ;;  %v3214_v1 = vld [vmem:[%s4523_s1 + $0x74] ss:$8 sps:$4 sm:$0xff]  }
  0x26   : > { %242 = vst.msk [vmem:[#allocation2 + $0x48] sm:$0xf] %vm239_vm0, %v3410_v0  ;;  %243 = vst.msk [vmem:[#allocation2 + $0x4c] sm:$0xf] %vm239_vm0, %v3410_v0  ;;  %s234_s15 = scalar_select %p233_p6, %s3465_s22, 1  ;;  %424 = vmatprep.subr.bf16.mxu0 %v3214_v1  ;;  %v3267_v56 = vld [vmem:[#allocation4 + $0xf8] sm:$0xff]  }
  0x27   : > { %v3216_v2 = vld [vmem:[%s4523_s1 + $0x34] ss:$8 sps:$4 sm:$0xff]   ;;  %v3218_v3 = vld [vmem:[%s4523_s1 + $0x70] ss:$8 sps:$4 sm:$0xff]   ;;  %v3220_v5 = vld [vmem:[%s4523_s1 + $0x64] ss:$8 sps:$4 sm:$0xff]  }
  0x28   : > { %v3219_v4 = vld [vmem:[%s4523_s1 + $0x30] ss:$8 sps:$4 sm:$0xff]   ;;  %585 = vmatprep.subr.bf16.mxu1 %v3216_v2  ;;  %425 = vmatpush1.bf16.msra.mxu0 %v3218_v3  ;;  %v3222_v6 = vld [vmem:[%s4523_s1 + $0x24] ss:$8 sps:$4 sm:$0xff]   ;;  %v3224_v7 = vld [vmem:[%s4523_s1 + $0x60] ss:$8 sps:$4 sm:$0xff]  }
  0x29   : > { %586 = vmatpush1.bf16.msra.mxu1 %v3219_v4  ;;  %s2949_s12 = sshll.u32 %s234_s15, 6  ;;  %426 = vmatprep.subr.bf16.mxu0 %v3220_v5  ;;  %v3225_v8 = vld [vmem:[%s4523_s1 + $0x20] ss:$8 sps:$4 sm:$0xff]   ;;  %v3226_v9 = vld [vmem:[%s4523_s1 + $0x54] ss:$8 sps:$4 sm:$0xff]   ;;  %vm1040_vm2 = vcmask 1040384  }
  0x2a   : > { %587 = vmatprep.subr.bf16.mxu1 %v3222_v6  ;;  %v3228_v10 = vld [vmem:[%s4523_s1 + $0x14] ss:$8 sps:$4 sm:$0xff]   ;;  %v3230_v11 = vld [vmem:[%s4523_s1 + $0x50] ss:$8 sps:$4 sm:$0xff]   ;;  %s3561_s9 = scalar_lea.vmem %s4522_s0, %s2949_s12  ;;  %v3232_v13 = vld [vmem:[%s4523_s1 + $0x44] ss:$8 sps:$4 sm:$0xff]  }
  0x2b   : > { %v3231_v12 = vld [vmem:[%s4523_s1 + $0x10] ss:$8 sps:$4 sm:$0xff]   ;;  %v3234_v14 = vld [vmem:[%s4523_s1 + $0x4] ss:$8 sps:$4 sm:$0xff]   ;;  %v3236_v15 = vld [vmem:[%s4523_s1 + $0x40] ss:$8 sps:$4 sm:$0xff]  }
  0x2c   : > { %427 = vmatpush1.bf16.msra.mxu0 %v3224_v7  ;;  %v244_v16 = vld [vmem:[%s3561_s9] sm:$0xf]  ;;  %v245_v17 = vld [vmem:[%s3561_s9 + $0x4] sm:$0xf]  ;;  %v3242_v19 = vld [vmem:[%s4523_s1 + $0xb4] ss:$8 sps:$4 sm:$0xff]  }
  0x2d   : > { %588 = vmatpush1.bf16.msra.mxu1 %v3225_v8  ;;  %428 = vmatprep.subr.bf16.mxu0 %v3226_v9  ;;  %260 = vst.msk [vmem:[#allocation2 + $0x8] sm:$0xf] %vm239_vm0, %v244_v16  ;;  %v3237_v18 = vld [vmem:[%s4523_s1] ss:$8 sps:$4 sm:$0xff]   ;;  %261 = vst.msk [vmem:[#allocation2 + $0xc] sm:$0xf] %vm239_vm0, %v245_v17 }
  0x2e   : > { %589 = vmatprep.subr.bf16.mxu1 %v3228_v10  ;;  %v246_v20 = vld [vmem:[%s3561_s9 + $0x8] sm:$0xf]  ;;  %v247_v21 = vld [vmem:[%s3561_s9 + $0xc] sm:$0xf]  ;;  %v248_v22 = vld [vmem:[%s3561_s9 + $0x10] sm:$0xf] }
  0x2f   : > { %262 = vst.msk [vmem:[#allocation2 + $0x10] sm:$0xf] %vm239_vm0, %v246_v20  ;;  %v249_v23 = vld [vmem:[%s3561_s9 + $0x14] sm:$0xf]  ;;  %v3239_v24 = vld [vmem:[#allocation2] sm:$0xff]   ;;  %v3268_v57 = vld [vmem:[#allocation4 + $0xb8] sm:$0xff]  }
  0x30   : > { %429 = vmatpush1.bf16.msra.mxu0 %v3230_v11  ;;  %263 = vst.msk [vmem:[#allocation2 + $0x14] sm:$0xf] %vm239_vm0, %v247_v21  ;;  %264 = vst.msk [vmem:[#allocation2 + $0x18] sm:$0xf] %vm239_vm0, %v248_v22  ;;  %v250_v25 = vld [vmem:[%s3561_s9 + $0x18] sm:$0xf] }
  0x31   : > { %590 = vmatpush1.bf16.msra.mxu1 %v3231_v12  ;;  %430 = vmatprep.subr.bf16.mxu0 %v3232_v13  ;;  %265 = vst.msk [vmem:[#allocation2 + $0x1c] sm:$0xf] %vm239_vm0, %v249_v23  ;;  %v251_v26 = vld [vmem:[%s3561_s9 + $0x1c] sm:$0xf]  ;;  %266 = vst.msk [vmem:[#allocation2 + $0x20] sm:$0xf] %vm239_vm0, %v250_v25 }
  0x32   : > { %591 = vmatprep.subr.bf16.mxu1 %v3234_v14  ;;  %267 = vst.msk [vmem:[#allocation2 + $0x24] sm:$0xf] %vm239_vm0, %v251_v26  ;;  %v252_v27 = vld [vmem:[%s3561_s9 + $0x20] sm:$0xf]  ;;  %v253_v28 = vld [vmem:[%s3561_s9 + $0x24] sm:$0xf] }
  0x33   : > { %v3240_v29 = vld [vmem:[%s4523_s1 + $0xb0] ss:$8 sps:$4 sm:$0xff]   ;;  %268 = vst.msk [vmem:[#allocation2 + $0x28] sm:$0xf] %vm239_vm0, %v252_v27  ;;  %269 = vst.msk [vmem:[#allocation2 + $0x2c] sm:$0xf] %vm239_vm0, %v253_v28 }
  0x34   : > { %431 = vmatpush1.bf16.msra.mxu0 %v3236_v15  ;;  %v3238_v30 = vld [vmem:[#allocation2 + $0x8] sm:$0xff]   ;;  %v256_v34 = vld [vmem:[%s3561_s9 + $0x30] sm:$0xf]  ;;  %v257_v35 = vld [vmem:[%s3561_s9 + $0x34] sm:$0xf]  ;;  %vm1043_vm4 = vcmask 1044484  }
  0x35   : > { %592 = vmatpush1.bf16.msra.mxu1 %v3237_v18  ;;  %827 = vmatprep.subr.bf16.mxu0 %v3242_v19  ;;  %v3247_v31 = vld [vmem:[%s4523_s1 + $0xa4] ss:$8 sps:$4 sm:$0xff]   ;;  %v254_v32 = vld [vmem:[%s3561_s9 + $0x28] sm:$0xf]  ;;  %272 = vst.msk [vmem:[#allocation2 + $0x38] sm:$0xf] %vm239_vm0, %v256_v34 }
  0x36   : > { %v255_v33 = vld [vmem:[%s3561_s9 + $0x2c] sm:$0xf]  ;;  %270 = vst.msk [vmem:[#allocation2 + $0x30] sm:$0xf] %vm239_vm0, %v254_v32  ;;  %v3245_v36 = vld [vmem:[%s4523_s1 + $0xa0] ss:$8 sps:$4 sm:$0xff]   ;;  %2967 = vmatprep.subr.bf16.mxu1 %v3267_v56 }
  0x37   : > { %2766 = vmatmul.mubr.msk.bf16.vlgmr.msra.gmra.mxu0 %vm391_vm1, %v3238_v30  ;;  %271 = vst.msk [vmem:[#allocation2 + $0x34] sm:$0xf] %vm239_vm0, %v255_v33  ;;  %273 = vst.msk [vmem:[#allocation2 + $0x3c] sm:$0xf] %vm239_vm0, %v257_v35  ;;  %v3252_v37 = vld [vmem:[%s4523_s1 + $0x94] ss:$8 sps:$4 sm:$0xff]  }
  0x38   : > { %2783 = vmatmul.mubr.msk.bf16.vlgmr.msra.gmra.mxu1 %vm391_vm1, %v3239_v24  ;;  %828 = vmatpush1.bf16.msra.mxu0 %v3240_v29  ;;  %v3243_v38 = vld [vmem:[#allocation2 + $0x10] sm:$0xff]   ;;  %v3257_v40 = vld [vmem:[%s4523_s1 + $0x84] ss:$8 sps:$4 sm:$0xff]   ;;  %v258_v41 = vld [vmem:[%s3561_s9 + $0x38] sm:$0xf]  ;;  %v4535_v9 = vmov 0 }
  0x39   : > { %619 = vmatprep.mubr.bf16.mxu1 %v3410_v0  ;;  %458 = vmatprep.mubr.bf16.mxu0 %v3410_v0  ;;  %v3250_v39 = vld [vmem:[%s4523_s1 + $0x90] ss:$8 sps:$4 sm:$0xff]   ;;  %v259_v42 = vld [vmem:[%s3561_s9 + $0x3c] sm:$0xf]  ;;  %274 = vst.msk [vmem:[#allocation2 + $0x40] sm:$0xf] %vm239_vm0, %v258_v41 }
  0x3a   : > { %829 = vmatprep.subr.bf16.mxu0 %v3247_v31  ;;  %275 = vst.msk [vmem:[#allocation2 + $0x44] sm:$0xf] %vm239_vm0, %v259_v42  ;;  %v3255_v43 = vld [vmem:[%s4523_s1 + $0x80] ss:$8 sps:$4 sm:$0xff]   ;;  %v3244_v44 = vld [vmem:[#allocation2 + $0x18] sm:$0xff]   ;;  %v3259_v50 = vld [vmem:[#allocation2 + $0x10] sm:$0xff]   ;;  %2968 = vmatpush3.bf16.msra.mxu1 %v3268_v57 }
  0x3b   : > { %v3248_v45 = vld [vmem:[#allocation2 + $0x20] sm:$0xff]   ;;  %v3249_v46 = vld [vmem:[#allocation2 + $0x28] sm:$0xff]   ;;  %v3260_v51 = vld [vmem:[#allocation2 + $0x18] sm:$0xff]   ;;  %vm1041_vm3 = vsmask.f32 256  ;;  %vm1342_vm14 = vcmask 1043456  }
  0x3c   : > { %830 = vmatpush1.bf16.msra.mxu0 %v3245_v36  ;;  %v3261_v52 = vld [vmem:[#allocation2 + $0x20] sm:$0xff]   ;;  %v3262_v53 = vld [vmem:[#allocation2 + $0x28] sm:$0xff]   ;;  %v3271_v1 = vld [vmem:[#allocation4 + $0xe8] sm:$0xff]   ;;  %vm1044_vm5 = vsmask.f32 4352  ;;  %vm1344_vm15 = vcmask 1047556  }
  0x3d   : > { %831 = vmatprep.subr.bf16.mxu0 %v3252_v37  ;;  %v3269_v59 = vld [vmem:[#allocation4 + $0xf0] sm:$0xff]   ;;  %v3266_v61 = vld [vmem:[#allocation2 + $0x48] sm:$0xff]   ;;  %v3272_v2 = vld [vmem:[#allocation4 + $0xa8] sm:$0xff]   ;;  %vm1071_vm8 = vsmask.f32 7938  ;;  %v4540_v20 = vmov 0 }
  0x3e   : > { %v3253_v47 = vld [vmem:[#allocation2 + $0x30] sm:$0xff]   ;;  %v3254_v48 = vld [vmem:[#allocation2 + $0x38] sm:$0xff]   ;;  %v3270_v60 = vld [vmem:[#allocation4 + $0xb0] sm:$0xff]   ;;  %2969 = vmatprep.subr.bf16.mxu1 %v3269_v59  ;;  %vm1073_vm9 = vsmask.f32 7954  ;;  %s230_s30 = sand.u32 1, %s3397_s19  }
  0x3f   : > { %2767 = vmatmul.mubr.msk.bf16.gmra.mxu0 %vm391_vm1, %v3243_v38  ;;  %v3263_v54 = vld [vmem:[#allocation2 + $0x30] sm:$0xff]   ;;  %v3264_v55 = vld [vmem:[#allocation2 + $0x38] sm:$0xff]   ;;  %2970 = vmatpush3.bf16.msra.mxu1 %v3270_v60  ;;  %v3273_v62 = vld [vmem:[#allocation4 + $0x78] sm:$0xff]   ;;  %s2739_s6 = sshll.u32 %s230_s30, 7  ;;  %s2966_s10 = sshll.u32 %s3465_s22, 11 }
  0x40   : > { %2784 = vmatmul.mubr.msk.bf16.gmra.mxu1 %vm391_vm1, %v3238_v30  ;;  %468 = vmatprep.mubr.bf16.mxu0 %v3410_v0  ;;  %v3275_v63 = vld [vmem:[#allocation4 + $0x38] sm:$0xff]   ;;  %v3277_v3 = vld [vmem:[#allocation4 + $0x70] sm:$0xff]   ;;  %v3281_v5 = vld [vmem:[#allocation4 + $0x28] sm:$0xff]   ;;  %s4394_s8 = scalar_lea.vmem [#allocation7], %s2739_s6  ;;  %s4474_s16 = scalar_lea.hbm %s4527_s5, %s2966_s10 }
  0x41   : > { %629 = vmatprep.mubr.bf16.mxu1 %v3410_v0  ;;  %832 = vmatpush1.bf16.msra.mxu0 %v3250_v39  ;;  %v3258_v49 = vld [vmem:[#allocation2 + $0x40] sm:$0xff]   ;;  %v3283_v6 = vld [vmem:[#allocation4 + $0x60] sm:$0xff]   ;;  %vm1042_vm6 = vmand %vm1040_vm2, %vm1041_vm3  ;;  %s2659_s11 = sshll.u32 %s4394_s8, 4  ;;  %s4482_s12 = scalar_lea.sflag [#allocation6], %s230_s30  ;;  %s4476_s11 = int_to_ptr.vmem [resolvable:$true] %s2659_s11 }
  0x42   : > { %833 = vmatprep.subr.bf16.mxu0 %v3257_v40  ;;  %v3265_v58 = vld [vmem:[#allocation2 + $0x40] sm:$0xff]   ;;  %2971 = vmatprep.subr.bf16.mxu1 %v3271_v1  ;;  %v3284_v7 = vld [vmem:[#allocation4 + $0x20] sm:$0xff]   ;;  %vm1045_vm7 = vmand %vm1043_vm4, %vm1044_vm5  ;;  %s3341_s22 = scalar_lea.vmem %s4476_s11, 2048  ;;  %s3411_s17 = smov [#allocation7]  }
  0x43   : > { %v3278_v4 = vld [vmem:[#allocation4 + $0x30] sm:$0xff]   ;;  %2972 = vmatpush3.bf16.msra.mxu1 %v3272_v2  ;;  %v1047_v8 = vld [vmem:[#allocation3 + $0x98] sm:$0x11]  ;;  %vm3680_vm10 = vmor %vm1045_vm7, %vm1042_vm6  ;;  %vm1460_vm6 = vsmask.f32 7440  ;;  %p3342_p8 = scmp.ne.s32.totalorder %s4476_s11, %s3341_s22  ;;  %s3345_s23 = sshll.u32 %s3411_s17, 4  ;;  %s3346_s23 = int_to_ptr.vmem [resolvable:$false] %s3345_s23 }
  0x44   : > { %v4536_v9 = vsel %vm3680_vm10, 4294967295, %v4535_v9  ;;  %v3285_v10 = vld [vmem:[#allocation4 + $0x58] sm:$0xff]   ;;  %v1048_v11 = vsel %vm3680_vm10, 0, %v1047_v8  ;;  %vm1072_vm11 = vmand %vm1040_vm2, %vm1071_vm8  ;;  %v1076_v14 = vld [vmem:[#allocation3 + $0x20] sm:$0x11]  ;;  %s3347_s25 = scalar_lea.vmem %s3346_s23, 4096  ;;  %p3348_p11 = scmp.lt.s32.totalorder %s4476_s11, %s3346_s23 }
  0x45   : > { %834 = vmatpush1.bf16.msra.mxu0 %v3255_v43  ;;  %4537 = vst [vmem:[#allocation10_spill] sm:$0xff] %v4536_v9  ;;  %v3287_v12 = vld [vmem:[#allocation4 + $0x18] sm:$0xff]   ;;  %1049 = vst [vmem:[#allocation3 + $0x98] sm:$0x11] %v1048_v11  ;;  %v3289_v16 = vld [vmem:[#allocation4 + $0x50] sm:$0xff]   ;;  %p3343_p9 = pnand %p3342_p8, %p3482_p5  ;;  %p3349_p12 = scmp.lt.s32.totalorder %s3347_s25, %s3341_s22 }
  0x46   : > { %3031 = vmatprep.subr.bf16.mxu0 %v3273_v62  ;;  %vm1074_vm12 = vmand %vm1043_vm4, %vm1073_vm9  ;;  %v3290_v17 = vld [vmem:[#allocation4 + $0x10] sm:$0xff]   ;;  %v3274_v18 = vld [vmem:[#allocation4 + $0xe0] sm:$0xff]   ;;  %vm1180_vm4 = vsmask.f32 4368 }
  0x47   : > { %2768 = vmatmul.mubr.msk.bf16.gmra.mxu0 %vm391_vm1, %v3244_v44  ;;  %vm3690_vm13 = vmor %vm1074_vm12, %vm1072_vm11  ;;  %v1050_v19 = vld [vmem:[#allocation3] sm:$0x11]  ;;  %2973 = vmatprep.subr.bf16.mxu1 %v3274_v18  ;;  %v3291_v23 = vld [vmem:[#allocation4 + $0x48] sm:$0xff]   ;;  %p3344_p10 = pneg %p3343_p9  ;;  %p3350_p13 = por %p3349_p12, %p3348_p11 }
  0x48   : > { %2785 = vmatmul.mubr.msk.bf16.gmra.mxu1 %vm391_vm1, %v3243_v38  ;;  %478 = vmatprep.mubr.bf16.mxu0 %v3410_v0  ;;  %v1077_v15 = vsel %vm3690_vm13, 0, %v1076_v14  ;;  %vm1343_vm0 = vmand %vm1342_vm14, %vm1071_vm8  ;;  %v3276_v21 = vld [vmem:[#allocation4 + $0xa0] sm:$0xff]   ;;  %v1051_v22 = vsel %vm3680_vm10, 0, %v1050_v19  ;;  %v3293_v24 = vld [vmem:[#allocation4 + $0x8] sm:$0xff]   ;;  %vm2241_vm8 = vcmask 1042432  }
  0x49   : > { %639 = vmatprep.mubr.bf16.mxu1 %v3410_v0  ;;  %1078 = vst [vmem:[#allocation3 + $0x20] sm:$0x11] %v1077_v15  ;;  %1052 = vst [vmem:[#allocation3] sm:$0x11] %v1051_v22  ;;  %2974 = vmatpush3.bf16.msra.mxu1 %v3276_v21  ;;  %v1079_v25 = vld [vmem:[#allocation3 + $0x38] sm:$0x11]  ;;  %p3351_p0 = pnand %p3350_p13, %p3344_p10 }
  0x4a   : > { %v3280_v26 = vld [vmem:[#allocation4 + $0xd8] sm:$0xff]   ;;  %v1080_v27 = vsel %vm3690_vm13, 0, %v1079_v25  ;;  %v3295_v28 = vld [vmem:[#allocation4 + $0x40] sm:$0xff]   ;;  %v1053_v31 = vld [vmem:[#allocation3 + $0x30] sm:$0x11] }
  0x4b   : > { %v3282_v29 = vld [vmem:[#allocation4 + $0x98] sm:$0xff]   ;;  %1081 = vst [vmem:[#allocation3 + $0x38] sm:$0x11] %v1080_v27  ;;  %v3296_v30 = vld [vmem:[#allocation4] sm:$0xff]   ;;  %2975 = vmatprep.subr.bf16.mxu1 %v3280_v26  ;;  %v1054_v32 = vsel %vm3680_vm10, 0, %v1053_v31  ;;  %v3286_v33 = vld [vmem:[#allocation4 + $0xd0] sm:$0xff]  }
  0x4c   : > { %1055 = vst [vmem:[#allocation3 + $0x30] sm:$0x11] %v1054_v32  ;;  %v3288_v34 = vld [vmem:[#allocation4 + $0x90] sm:$0xff]   ;;  %v1082_v35 = vld [vmem:[#allocation3 + $0x48] sm:$0x11]  ;;  %v3297_v41 = vld [vmem:[#allocation4 + $0xc0] sm:$0xff]  }
  0x4d   : > { %2976 = vmatpush3.bf16.msra.mxu1 %v3282_v29  ;;  %v1083_v36 = vsel %vm3690_vm13, 0, %v1082_v35  ;;  %v3292_v37 = vld [vmem:[#allocation4 + $0xc8] sm:$0xff]   ;;  %v3298_v42 = vld [vmem:[#allocation4 + $0x80] sm:$0xff]   ;;  %v1085_v43 = vld [vmem:[#allocation3 + $0x50] sm:$0x11] }
  0x4e   : > { %2977 = vmatprep.subr.bf16.mxu1 %v3286_v33  ;;  %1084 = vst [vmem:[#allocation3 + $0x48] sm:$0x11] %v1083_v36  ;;  %v3294_v38 = vld [vmem:[#allocation4 + $0x88] sm:$0xff]   ;;  %v1065_v59 = vld [vmem:[#allocation3 + $0x10] sm:$0x11]  ;;  %vm3965_vm5 = vmor %vm1041_vm3, %vm1180_vm4 }
  0x4f   : > { %2769 = vmatmul.mubr.msk.bf16.gmra.mxu0 %vm391_vm1, %v3248_v45  ;;  %v1056_v39 = vld [vmem:[#allocation3 + $0x28] sm:$0x11]  ;;  %v1066_v60 = vsel %vm3680_vm10, 0, %v1065_v59  ;;  %v964_v9 = vld [vmem:[%s4524_s2] sm:$0x3] }
  0x50   : > { %2786 = vmatmul.mubr.msk.bf16.gmra.mxu1 %vm391_vm1, %v3244_v44  ;;  %488 = vmatprep.mubr.bf16.mxu0 %v3410_v0  ;;  %v1057_v40 = vsel %vm3680_vm10, 0, %v1056_v39  ;;  %v1086_v44 = vsel %vm3690_vm13, 0, %v1085_v43  ;;  %1067 = vst [vmem:[#allocation3 + $0x10] sm:$0x11] %v1066_v60  ;;  %v1097_v22 = vld [vmem:[#allocation3 + $0x68] sm:$0x11] }
  0x51   : > { %649 = vmatprep.mubr.bf16.mxu1 %v3410_v0  ;;  %2978 = vmatpush3.bf16.msra.mxu1 %v3288_v34  ;;  %1058 = vst [vmem:[#allocation3 + $0x28] sm:$0x11] %v1057_v40  ;;  %1087 = vst [vmem:[#allocation3 + $0x50] sm:$0x11] %v1086_v44  ;;  %v1098_v25 = vsel %vm3690_vm13, 0, %v1097_v22 }
  0x52   : > { %2979 = vmatprep.subr.bf16.mxu1 %v3292_v37  ;;  %1099 = vst [vmem:[#allocation3 + $0x68] sm:$0x11] %v1098_v25  ;;  %vm1459_vm3 = vsmask.f32 3328 }
  0x53   : > { %vm4035_vm7 = vmor %vm1459_vm3, %vm1460_vm6 }
  0x55   : > { %2980 = vmatpush3.bf16.msra.mxu1 %v3294_v38 }
  0x56   : > { %2981 = vmatprep.subr.bf16.mxu1 %v3297_v41 }
  0x57   : > { %2770 = vmatmul.mubr.msk.bf16.gmra.mxu0 %vm391_vm1, %v3249_v46 }
  0x58   : > { %2787 = vmatmul.mubr.msk.bf16.gmra.mxu1 %vm391_vm1, %v3248_v45  ;;  %498 = vmatprep.mubr.bf16.mxu0 %v3410_v0  ;;  %v1059_v45 = vld [vmem:[#allocation3 + $0x70] sm:$0x11] }
  0x59   : > { %659 = vmatprep.mubr.bf16.mxu1 %v3410_v0  ;;  %2982 = vmatpush3.bf16.msra.mxu1 %v3298_v42 }
  0x5f   : > { %2771 = vmatmul.mubr.msk.bf16.gmra.mxu0 %vm391_vm1, %v3253_v47 }
  0x60   : > { %2788 = vmatmul.mubr.msk.bf16.gmra.mxu1 %vm391_vm1, %v3249_v46  ;;  %508 = vmatprep.mubr.bf16.mxu0 %v3410_v0  ;;  %v1060_v46 = vsel %vm3680_vm10, 0, %v1059_v45 }
  0x61   : > { %669 = vmatprep.mubr.bf16.mxu1 %v3410_v0  ;;  %1061 = vst [vmem:[#allocation3 + $0x70] sm:$0x11] %v1060_v46 }
  0x67   : > { %2772 = vmatmul.mubr.msk.bf16.gmra.mxu0 %vm391_vm1, %v3254_v48 }
  0x68   : > { %2789 = vmatmul.mubr.msk.bf16.gmra.mxu1 %vm391_vm1, %v3253_v47  ;;  %518 = vmatprep.mubr.bf16.mxu0 %v3410_v0  ;;  %v1088_v47 = vld [vmem:[#allocation3 + $0xa8] sm:$0x11] }
  0x69   : > { %679 = vmatprep.mubr.bf16.mxu1 %v3410_v0 }
  0x6f   : > { %2773 = vmatmul.mubr.msk.bf16.gmra.mxu0 %vm391_vm1, %v3258_v49  ;;  %v1062_v49 = vld [vmem:[#allocation3 + $0x78] sm:$0x11] }
  0x70   : > { %2790 = vmatmul.mubr.msk.bf16.gmra.mxu1 %vm391_vm1, %v3254_v48  ;;  %851 = vmatprep.mubr.bf16.mxu0 %v3410_v0  ;;  %v1089_v48 = vsel %vm3690_vm13, 0, %v1088_v47 }
  0x71   : > { %1090 = vst [vmem:[#allocation3 + $0xa8] sm:$0x11] %v1089_v48 }
  0x77   : > { %2815 = vmatmul.mubr.msk.bf16.vlgmr.msra.gmra.mxu0 %vm391_vm1, %v3259_v50  ;;  %v1063_v50 = vsel %vm3680_vm10, 0, %v1062_v49 }
  0x78   : > { %861 = vmatprep.mubr.bf16.mxu0 %v3410_v0  ;;  %3032 = vmatpush3.bf16.msra.mxu0 %v3275_v63  ;;  %1064 = vst [vmem:[#allocation3 + $0x78] sm:$0x11] %v1063_v50 }
  0x79   : > { %3033 = vmatprep.subr.bf16.mxu0 %v3277_v3 }
  0x7c   : > { %3034 = vmatpush3.bf16.msra.mxu0 %v3278_v4 }
  0x7f   : > { %2816 = vmatmul.mubr.msk.bf16.gmra.mxu0 %vm391_vm1, %v3260_v51 }
  0x80   : > { %871 = vmatprep.mubr.bf16.mxu0 %v3410_v0 }
  0x87   : > { %2817 = vmatmul.mubr.msk.bf16.gmra.mxu0 %vm391_vm1, %v3261_v52  ;;  %v3299_v52 = vld [vmem:[#allocation4 + $0x178] sm:$0xff]  }
  0x88   : > { %881 = vmatprep.mubr.bf16.mxu0 %v3410_v0  ;;  %3095 = vmatprep.subr.bf16.mxu1 %v3299_v52  ;;  %v966_v52 = vlaneseq }
  0x8a   : > { %v967_v60 = vshrl.u32 %v966_v52, 7 }
  0x8f   : > { %2818 = vmatmul.mubr.msk.bf16.gmra.mxu0 %vm391_vm1, %v3262_v53 }
  0x90   : > { %891 = vmatprep.mubr.bf16.mxu0 %v3410_v0 }
  0x97   : > { %2819 = vmatmul.mubr.msk.bf16.gmra.mxu0 %vm391_vm1, %v3263_v54 }
  0x98   : > { %901 = vmatprep.mubr.bf16.mxu0 %v3410_v0 }
  0x9f   : > { %2820 = vmatmul.mubr.msk.bf16.gmra.mxu0 %vm391_vm1, %v3264_v55  ;;  %v1091_v55 = vld [vmem:[#allocation3 + $0x40] sm:$0x11] }
  0xa0   : > { %911 = vmatprep.mubr.bf16.mxu0 %v3410_v0  ;;  %v1092_v56 = vsel %vm3690_vm13, 0, %v1091_v55 }
  0xa1   : > { %1093 = vst [vmem:[#allocation3 + $0x40] sm:$0x11] %v1092_v56 }
  0xa7   : > { %2821 = vmatmul.mubr.msk.bf16.gmra.mxu0 %vm391_vm1, %v3265_v58 }
  0xa8   : > { %921 = vmatprep.mubr.bf16.mxu0 %v3410_v0  ;;  %v3279_v0 = vld [vmem:[#allocation4 + $0x68] sm:$0xff]  }
  0xa9   : > { %3035 = vmatprep.subr.bf16.mxu0 %v3279_v0 }
  0xaa   : > { %3036 = vmatpush3.bf16.msra.mxu0 %v3281_v5  ;;  %v1094_v5 = vld [vmem:[#allocation3 + $0xa0] sm:$0x11] }
  0xab   : > { %3037 = vmatprep.subr.bf16.mxu0 %v3283_v6  ;;  %v1095_v6 = vsel %vm3690_vm13, 0, %v1094_v5 }
  0xac   : > { %1096 = vst [vmem:[#allocation3 + $0xa0] sm:$0x11] %v1095_v6 }
  0xae   : > { %3038 = vmatpush3.bf16.msra.mxu0 %v3284_v7 }
  0xaf   : > { %2822 = vmatmul.mubr.msk.bf16.gmra.mxu0 %vm391_vm1, %v3266_v61  ;;  %3039 = vmatprep.subr.bf16.mxu0 %v3285_v10  ;;  %vm1345_vm1 = vmand %vm1344_vm15, %vm1073_vm9  ;;  %vm2242_vm9 = vcmask 1046532  }
  0xb0   : > { %vm3698_vm2 = vmor %vm1345_vm1, %vm1343_vm0 }
  0xb1   : > { %v4541_v20 = vsel %vm3698_vm2, 4294967295, %v4540_v20 }
  0xb2   : > { %3040 = vmatpush3.bf16.msra.mxu0 %v3287_v12  ;;  %4542 = vst [vmem:[#allocation11_spill] sm:$0xff] %v4541_v20  ;;  %v1068_v12 = vld [vmem:[#allocation3 + $0xb8] sm:$0x11]  ;;  %v972_v20 = vsub.s32 1, %v967_v60 }
  0xb3   : > { %3041 = vmatprep.subr.bf16.mxu0 %v3289_v16  ;;  %v1069_v14 = vsel %vm3680_vm10, 0, %v1068_v12 }
  0xb4   : > { %1070 = vst [vmem:[#allocation3 + $0xb8] sm:$0x11] %v1069_v14  ;;  %v968_v14 = vsub.s32 0, %v967_v60 }
  0xb6   : > { %3042 = vmatpush3.bf16.msra.mxu0 %v3290_v17 }
  0xb7   : > { %3043 = vmatprep.subr.bf16.mxu0 %v3291_v23 }
  0xba   : > { %3044 = vmatpush3.bf16.msra.mxu0 %v3293_v24 }
  0xbb   : > { %3045 = vmatprep.subr.bf16.mxu0 %v3295_v28 }
  0xbe   : > { %3046 = vmatpush3.bf16.msra.mxu0 %v3296_v30 }
  0xf7   : > { %v3722_v53 = vpop.f32.mrf.mxu0 }
  0xf8   : > { %v3720_v51 = vpop.f32.mrf.mxu1 }
  0xf9   : > { %v3728_v57 = vpop.f32.mrf.mxu0  ;;  %v612_v52 = vadd.f32 %v3720_v51, %v3722_v53 }
  0xfa   : > { %v3724_v54 = vpop.f32.mrf.mxu1 }
  0xfb   : > { %v3734_v61 = vpop.f32.mrf.mxu0 }
  0xfc   : > { %v3730_v58 = vpop.f32.mrf.mxu1 }
  0xfd   : > { %v3738_v63 = vpop.f32.mrf.mxu0 }
  0xfe   : > { %v3736_v62 = vpop.f32.mrf.mxu1 }
  0xff   : > { %v3742_v2 = vpop.f32.mrf.mxu0  ;;  %v618_v60 = vadd.f32 %v3736_v62, %v3738_v63 }
 0x100   : > { %v3740_v1 = vpop.f32.mrf.mxu1 }
 0x101   : > { %v3746_v4 = vpop.f32.mrf.mxu0  ;;  %v622_v51 = vadd.f32 %v3740_v1, %v3742_v2 }
 0x102   : > { %v3744_v3 = vpop.f32.mrf.mxu1 }
 0x103   : > { %v3752_v7 = vpop.f32.mrf.mxu0  ;;  %v624_v53 = vadd.f32 %v3744_v3, %v3746_v4 }
 0x104   : > { %v3748_v0 = vpop.f32.mrf.mxu1 }
 0x105   : > { %v3756_v10 = vpop.f32.mrf.mxu0 }
 0x106   : > { %v3754_v8 = vpop.f32.mrf.mxu1 }
 0x107   : > { %v3762_v15 = vpop.f32.mrf.mxu0 }
 0x108   : > { %v3758_v11 = vpop.f32.mrf.mxu1 }
 0x109   : > { %v3766_v17 = vpop.f32.mrf.mxu0 }
 0x10a   : > { %v3764_v16 = vpop.f32.mrf.mxu1 }
 0x10b   : > { %v3770_v19 = vpop.f32.mrf.mxu0 }
 0x10c   : > { %v3768_v18 = vpop.f32.mrf.mxu1 }
 0x10d   : > { %v3774_v23 = vpop.f32.mrf.mxu0  ;;  %v3876_v62 = vadd.f32 %v3768_v18, %v3770_v19 }
 0x10e   : > { %v3772_v21 = vpop.f32.mrf.mxu1 }
 0x10f   : > { %v3780_v26 = vpop.f32.mrf.mxu0  ;;  %v3880_v63 = vadd.f32 %v3772_v21, %v3774_v23 }
 0x110   : > { %v3776_v24 = vpop.f32.mrf.mxu1 }
 0x111   : > { %v3784_v28 = vpop.f32.mrf.mxu0  ;;  %v3885_v3 = vadd.f32 %v3776_v24, %v3780_v26 }
 0x112   : > { %v3782_v27 = vpop.f32.mrf.mxu1 }
 0x113   : > { %v484_v30 = vpop.f32.mrf.mxu0  ;;  %v3889_v4 = vadd.f32 %v3782_v27, %v3784_v28 }
 0x114   : > { %v3786_v29 = vpop.f32.mrf.mxu1 }
 0x115   : > { %v486_v32 = vpop.f32.mrf.mxu0 }
 0x116   : > { %v647_v31 = vpop.f32.mrf.mxu1 }
 0x117   : > { %v3790_v34 = vpop.f32.mrf.mxu0 }
 0x118   : > { %v3788_v33 = vpop.f32.mrf.mxu1 }
 0x119   : > { %v3794_v13 = vpop.f32.mrf.mxu0 }
 0x11a   : > { %v3792_v35 = vpop.f32.mrf.mxu1 }
 0x11b   : > { %v3798_v37 = vpop.f32.mrf.mxu0  ;;  %v3903_v18 = vadd.f32 %v3792_v35, %v3794_v13 }
 0x11c   : > { %v3796_v36 = vpop.f32.mrf.mxu1 }
 0x11d   : > { %v3802_v39 = vpop.f32.mrf.mxu0  ;;  %v3907_v19 = vadd.f32 %v3796_v36, %v3798_v37 }
 0x11e   : > { %v3800_v38 = vpop.f32.mrf.mxu1 }
 0x11f   : > { %v3806_v41 = vpop.f32.mrf.mxu0  ;;  %v3911_v21 = vadd.f32 %v3800_v38, %v3802_v39 }
 0x120   : > { %v3804_v40 = vpop.f32.mrf.mxu1 }
 0x121   : > { %v3810_v43 = vpop.f32.mrf.mxu0  ;;  %v3915_v26 = vadd.f32 %v3804_v40, %v3806_v41 }
 0x122   : > { %v3808_v42 = vpop.f32.mrf.mxu1 }
 0x123   : > { %v3814_v45 = vpop.f32.mrf.mxu0 }
 0x124   : > { %v3812_v44 = vpop.f32.mrf.mxu1 }
 0x125   : > { %v3818_v47 = vpop.f32.mrf.mxu0 }
 0x126   : > { %v3816_v46 = vpop.f32.mrf.mxu1 }
 0x127   : > { %v3820_v48 = vpop.f32.mrf.mxu0 }
 0x128   : > { %v3822_v49 = vpop.f32.mrf.mxu1 }
 0x129   : > { %4543 = vst [vmem:[#allocation12_spill] sm:$0xff] %v3822_v49  ;;  %v3824_v50 = vpop.f32.mrf.mxu0 }
 0x12a   : > { %4544 = vst [vmem:[#allocation13_spill] sm:$0xff] %v3824_v50  ;;  %v3826_v55 = vpop.f32.mrf.mxu1  ;;  %v3851_v50 = vrot.slane %v964_v9, %v972_v20  ;;  %v628_v20 = vadd.f32 %v3754_v8, %v3756_v10 }
 0x12b   : > { %4545 = vst [vmem:[#allocation14_spill] sm:$0xff] %v3826_v55  ;;  %v3828_v56 = vpop.f32.mrf.mxu0 }
 0x12c   : > { %4546 = vst [vmem:[#allocation15_spill] sm:$0xff] %v3828_v56  ;;  %v3832_v5 = vpop.f32.mrf.mxu1 }
 0x12d   : > { %v3830_v59 = vpop.f32.mrf.mxu0  ;;  %4548 = vst [vmem:[#allocation17_spill] sm:$0xff] %v3832_v5 }
 0x12e   : > { %4547 = vst [vmem:[#allocation16_spill] sm:$0xff] %v3830_v59  ;;  %v677_v22 = vpop.f32.mrf.mxu1  ;;  %v3847_v59 = vrot.slane %v964_v9, %v968_v14  ;;  %v626_v9 = vadd.f32 %v3748_v0, %v3752_v7  ;;  %v3892_v0 = vadd.f32 %v3786_v29, %v484_v30  ;;  %v3894_v7 = vadd.f32 %v647_v31, %v486_v32 }
 0x12f   : > { %v3834_v6 = vpop.f32.mrf.mxu0  ;;  %v3920_v30 = vadd.f32 %v3808_v42, %v3810_v43  ;;  %v3924_v31 = vadd.f32 %v3812_v44, %v3814_v45  ;;  %v3928_v32 = vadd.f32 %v3816_v46, %v3818_v47 }
 0x130   : > { %4549 = vst [vmem:[#allocation18_spill] sm:$0xff] %v3834_v6  ;;  %v681_v5 = vpop.f32.mrf.mxu1 }
 0x131   : > { %v3836_v12 = vpop.f32.mrf.mxu0  ;;  %v4554_v39 = vld [vmem:[#allocation13_spill] sm:$0xff] }
 0x132   : > { %4550 = vst [vmem:[#allocation19_spill] sm:$0xff] %v3836_v12  ;;  %v614_v12 = vadd.f32 %v3724_v54, %v3728_v57  ;;  %v3868_v54 = vadd.f32 %v3758_v11, %v3762_v15  ;;  %v3872_v57 = vadd.f32 %v3764_v16, %v3766_v17  ;;  %v3899_v17 = vadd.f32 %v3788_v33, %v3790_v34  ;;  %v4553_v33 = vld [vmem:[#allocation12_spill] sm:$0xff]  ;;  %v4555_v40 = vld [vmem:[#allocation14_spill] sm:$0xff] }
 0x133   : > { %v3838_v25 = vpop.f32.mrf.mxu0  ;;  %v3932_v34 = vadd.f32 %v4553_v33, %v3820_v48  ;;  %v3937_v41 = vadd.f32 %v4555_v40, %v4554_v39  ;;  %v4556_v42 = vld [vmem:[#allocation15_spill] sm:$0xff] }
 0x134   : > { %4551 = vst [vmem:[#allocation20_spill] sm:$0xff] %v3838_v25  ;;  %v616_v25 = vadd.f32 %v3730_v58, %v3734_v61  ;;  %v683_v58 = vpop.f32.mrf.mxu1  ;;  %v4557_v43 = vld [vmem:[#allocation17_spill] sm:$0xff] }
 0x135   : > { %v3843_v55 = vpop.f32.mrf.mxu0  ;;  %v3941_v44 = vadd.f32 %v4557_v43, %v4556_v42  ;;  %v4558_v45 = vld [vmem:[#allocation16_spill] sm:$0xff] }
 0x136   : > { %4552 = vst [vmem:[#allocation21_spill] sm:$0xff] %v3843_v55  ;;  %v685_v23 = vpop.f32.mrf.mxu1  ;;  %v3944_v46 = vadd.f32 %v677_v22, %v4558_v45 }
 0x137   : > { %v853_v6 = vpop.f32.mrf.mxu0 }
 0x138   : > { %v932_v56 = vadd.f32 %v853_v6, %v612_v52  ;;  %v687_v47 = vpop.f32.mrf.mxu1 }
 0x139   : > { %v855_v55 = vpop.f32.mrf.mxu0 }
 0x13a   : > { %v976_v14 = vadd.f32 %v3847_v59, %v932_v56  ;;  %v933_v49 = vadd.f32 %v855_v55, %v614_v12 }
 0x13b   : > { %v857_v61 = vpop.f32.mrf.mxu0 }
 0x13c   : > { %v977_v1 = vadd.f32 %v3851_v50, %v933_v49  ;;  %v934_v2 = vadd.f32 %v857_v61, %v616_v25  ;;  %v1008_v10 = vmax.f32 %v976_v14, 0.0  ;;  %v4559_v25 = vld [vmem:[#allocation18_spill] sm:$0xff]  ;;  %v4561_v14 = vld [vmem:[#allocation20_spill] sm:$0xff] }
 0x13d   : > { %v859_v8 = vpop.f32.mrf.mxu0  ;;  %v3947_v52 = vadd.f32 %v681_v5, %v4559_v25  ;;  %v3953_v61 = vadd.f32 %v685_v23, %v4561_v14 }
 0x13e   : > { %v1009_v11 = vmax.f32 %v977_v1, 0.0  ;;  %v978_v15 = vadd.f32 %v3847_v59, %v934_v2  ;;  %v935_v16 = vadd.f32 %v859_v8, %v618_v60  ;;  %v4560_v60 = vld [vmem:[#allocation19_spill] sm:$0xff]  ;;  %v1347_v1 = vld [vmem:[#allocation3 + $0x98] sm:$0xff] }
 0x13f   : > { %v863_v24 = vpop.f32.mrf.mxu0  ;;  %v4562_v8 = vld [vmem:[#allocation21_spill] sm:$0xff] }
 0x140   : > { %v2950_v27 = vpack.c.bf16 %v1009_v11, %v1008_v10  ;;  %v979_v28 = vadd.f32 %v3851_v50, %v935_v16  ;;  %v936_v29 = vadd.f32 %v863_v24, %v622_v51  ;;  %v1010_v36 = vmax.f32 %v978_v15, 0.0 }
 0x141   : > { %v865_v35 = vpop.f32.mrf.mxu0  ;;  %v3950_v51 = vadd.f32 %v683_v58, %v4560_v60 }
 0x142   : > { %v1183_v13 = vshrl.u32 %v2950_v27, 16  ;;  %v1011_v37 = vmax.f32 %v979_v28, 0.0  ;;  %v980_v38 = vadd.f32 %v3847_v59, %v936_v29  ;;  %v937_v48 = vadd.f32 %v865_v35, %v624_v53 }
 0x143   : > { %v867_v49 = vpop.f32.mrf.mxu0  ;;  %v1186_v56 = vshll.u32 %v2950_v27, 16  ;;  %v3957_v53 = vadd.f32 %v687_v47, %v4562_v8  ;;  %v1354_v8 = vld [vmem:[#allocation3] sm:$0xff] }
 0x144   : > { %v1185_v55 = vrot.slane %v1183_v13, 7  ;;  %v2951_v6 = vpack.c.bf16 %v1011_v37, %v1010_v36  ;;  %v938_v12 = vadd.f32 %v867_v49, %v626_v9  ;;  %v981_v22 = vadd.f32 %v3851_v50, %v937_v48  ;;  %v1351_v13 = vld [vmem:[#allocation3 + $0x20] sm:$0x11] }
 0x145   : > { %v869_v2 = vpop.f32.mrf.mxu0  ;;  %v1012_v15 = vmax.f32 %v980_v38, 0.0 }
 0x146   : > { %v1188_v10 = vor.u32 %v1186_v56, %v1185_v55  ;;  %v1191_v11 = vshrl.u32 %v2951_v6, 16  ;;  %v1189_v9 = vrot.slane %v1185_v55, 4  ;;  %v1013_v16 = vmax.f32 %v981_v22, 0.0 }
 0x147   : > { %v982_v5 = vadd.f32 %v3847_v59, %v938_v12  ;;  %v939_v24 = vadd.f32 %v869_v2, %v628_v20  ;;  %v873_v58 = vpop.f32.mrf.mxu0  ;;  %v1194_v29 = vshll.u32 %v2951_v6, 16 }
 0x148   : > { %v1348_v23 = vsel %vm3698_vm2, %v1188_v10, %v1347_v1  ;;  %v1193_v28 = vrot.slane %v1191_v11, 7  ;;  %v940_v33 = vadd.f32 %v873_v58, %v3868_v54  ;;  %v2952_v36 = vpack.c.bf16 %v1013_v16, %v1012_v15 }
 0x149   : > { %1349 = vst [vmem:[#allocation3 + $0x98] sm:$0xff] %v1348_v23  ;;  %v1014_v37 = vmax.f32 %v982_v5, 0.0  ;;  %v983_v20 = vadd.f32 %v3851_v50, %v939_v24  ;;  %v875_v38 = vpop.f32.mrf.mxu0  ;;  %v1463_v39 = vshrl.u32 %v1348_v23, 16  ;;  %v1466_v55 = vshll.u32 %v1348_v23, 16 }
 0x14a   : > { %v1196_v40 = vor.u32 %v1194_v29, %v1193_v28  ;;  %v1198_v42 = vrot.slane %v1193_v28, 4  ;;  %v984_v43 = vadd.f32 %v3847_v59, %v940_v33  ;;  %v941_v54 = vadd.f32 %v875_v38, %v3872_v57  ;;  %v1358_v38 = vld [vmem:[#allocation3 + $0x38] sm:$0x11] }
 0x14b   : > { %v1200_v45 = vshrl.u32 %v2952_v36, 16  ;;  %v1203_v47 = vshll.u32 %v2952_v36, 16  ;;  %v1015_v48 = vmax.f32 %v983_v20, 0.0  ;;  %v877_v49 = vpop.f32.mrf.mxu0 }
 0x14c   : > { %v3974_v56 = vsel %vm3965_vm5, %v1189_v9, %v1196_v40  ;;  %v1352_v12 = vsel %vm3680_vm10, %v1198_v42, %v1351_v13  ;;  %v1016_v25 = vmax.f32 %v984_v43, 0.0  ;;  %v985_v60 = vadd.f32 %v3851_v50, %v941_v54 }
 0x14d   : > { %1353 = vst [vmem:[#allocation3 + $0x20] sm:$0x11] %v1352_v12  ;;  %v1202_v14 = vrot.slane %v1200_v45, 7  ;;  %v2953_v1 = vpack.c.bf16 %v1015_v48, %v1014_v37  ;;  %v942_v57 = vadd.f32 %v877_v49, %v3876_v62  ;;  %v879_v22 = vpop.f32.mrf.mxu0  ;;  %v2872_v2 = vcombine.high %v1348_v23, %v3974_v56 }
 0x14e   : > { %v1017_v10 = vmax.f32 %v985_v60, 0.0  ;;  %v943_v11 = vadd.f32 %v879_v22, %v3880_v63  ;;  %v2871_v15 = vcombine.low %v1348_v23, %v3974_v56  ;;  %v3983_v9 = vrot.slane %v1463_v39, 4 }
 0x14f   : > { %v1205_v16 = vor.u32 %v1203_v47, %v1202_v14  ;;  %v1206_v5 = vrot.slane %v1202_v14, 4  ;;  %v1208_v24 = vshrl.u32 %v2953_v1, 16  ;;  %v1211_v58 = vshll.u32 %v2953_v1, 16  ;;  %v883_v28 = vpop.f32.mrf.mxu0  ;;  %2152 = vmatprep.mubr.bf16.mxu0 %v2872_v2  ;;  %v1361_v1 = vld [vmem:[#allocation3 + $0x30] sm:$0xff] }
 0x150   : > { %v2954_v29 = vpack.c.bf16 %v1017_v10, %v1016_v25  ;;  %v986_v62 = vadd.f32 %v3847_v59, %v942_v57  ;;  %v987_v33 = vadd.f32 %v3851_v50, %v943_v11  ;;  %v944_v13 = vadd.f32 %v883_v28, %v3885_v3  ;;  %2153 = vmatmul.mubr.bf16.vlgmr.msra.gmra.mxu0 %v2871_v15 }
 0x151   : > { %v3990_v63 = vsel %vm3698_vm2, %v1205_v16, %v1354_v8  ;;  %v1210_v23 = vrot.slane %v1208_v24, 7  ;;  %v885_v36 = vpop.f32.mrf.mxu0  ;;  %v1468_v37 = vrot.slane %v1466_v55, 5  ;;  %v1472_v20 = vshll.u32 %v3974_v56, 16 }
 0x152   : > { %1356 = vst [vmem:[#allocation3] sm:$0xff] %v3990_v63  ;;  %v1217_v39 = vshrl.u32 %v2954_v29, 16  ;;  %v1220_v40 = vshll.u32 %v2954_v29, 16  ;;  %v1018_v42 = vmax.f32 %v986_v62, 0.0  ;;  %v1019_v43 = vmax.f32 %v987_v33, 0.0 }
 0x153   : > { %v1213_v54 = vor.u32 %v1211_v58, %v1210_v23  ;;  %v1215_v45 = vrot.slane %v1210_v23, 4  ;;  %v988_v3 = vadd.f32 %v3847_v59, %v944_v13  ;;  %v945_v47 = vadd.f32 %v885_v36, %v3889_v4  ;;  %v887_v48 = vpop.f32.mrf.mxu0  ;;  %v1365_v33 = vld [vmem:[#allocation3 + $0x48] sm:$0x11] }
 0x154   : > { %v1219_v49 = vrot.slane %v1217_v39, 7  ;;  %v2955_v55 = vpack.c.bf16 %v1019_v43, %v1018_v42  ;;  %v946_v12 = vadd.f32 %v887_v48, %v3892_v0  ;;  %v1487_v25 = vshrl.u32 %v3990_v63, 16 }
 0x155   : > { %v4000_v60 = vsel %vm3965_vm5, %v1206_v5, %v1213_v54  ;;  %v1359_v14 = vsel %vm3680_vm10, %v1215_v45, %v1358_v38  ;;  %v1020_v57 = vmax.f32 %v988_v3, 0.0  ;;  %v989_v4 = vadd.f32 %v3851_v50, %v945_v47  ;;  %v889_v22 = vpop.f32.mrf.mxu0  ;;  %v4020_v47 = vld [vmem:[#allocation3 + $0x20] sm:$0x11] }
 0x156   : > { %1360 = vst [vmem:[#allocation3 + $0x38] sm:$0x11] %v1359_v14  ;;  %v1222_v2 = vor.u32 %v1220_v40, %v1219_v49  ;;  %v1223_v8 = vrot.slane %v1219_v49, 4  ;;  %v1225_v10 = vshrl.u32 %v2955_v55, 16  ;;  %v1228_v11 = vshll.u32 %v2955_v55, 16 }
 0x157   : > { %v1021_v0 = vmax.f32 %v989_v4, 0.0  ;;  %v990_v15 = vadd.f32 %v3847_v59, %v946_v12  ;;  %v947_v16 = vadd.f32 %v889_v22, %v3894_v7  ;;  %v893_v5 = vpop.f32.mrf.mxu0  ;;  %v1490_v24 = vshll.u32 %v3990_v63, 16  ;;  %v1368_v4 = vld [vmem:[#allocation3 + $0x28] sm:$0xff] }
 0x158   : > { %v4010_v58 = vsel %vm3698_vm2, %v1222_v2, %v1361_v1  ;;  %v1227_v28 = vrot.slane %v1225_v10, 7  ;;  %v948_v29 = vadd.f32 %v893_v5, %v3899_v17  ;;  %v2874_v62 = vcombine.high %v3990_v63, %v4000_v60 }
 0x159   : > { %1363 = vst [vmem:[#allocation3 + $0x30] sm:$0xff] %v4010_v58  ;;  %v2956_v13 = vpack.c.bf16 %v1021_v0, %v1020_v57  ;;  %v1022_v23 = vmax.f32 %v990_v15, 0.0  ;;  %v991_v7 = vadd.f32 %v3851_v50, %v947_v16  ;;  %v895_v36 = vpop.f32.mrf.mxu0  ;;  %v1469_v38 = vor.u32 %v1468_v37, %v3983_v9 }
 0x15a   : > { %v1230_v39 = vor.u32 %v1228_v11, %v1227_v28  ;;  %v1232_v40 = vrot.slane %v1227_v28, 4  ;;  %v992_v42 = vadd.f32 %v3847_v59, %v948_v29  ;;  %v949_v43 = vadd.f32 %v895_v36, %v3903_v18  ;;  %2160 = vmatprep.mubr.bf16.mxu0 %v2874_v62  ;;  %v1372_v36 = vld [vmem:[#allocation3 + $0x50] sm:$0x11] }
 0x15b   : > { %v1234_v17 = vshrl.u32 %v2956_v13, 16  ;;  %v1237_v54 = vshll.u32 %v2956_v13, 16  ;;  %v1023_v45 = vmax.f32 %v991_v7, 0.0  ;;  %v897_v3 = vpop.f32.mrf.mxu0  ;;  %v1470_v48 = vrot.slane %v1469_v38, 4 }
 0x15c   : > { %v4024_v49 = vsel %vm3965_vm5, %v1223_v8, %v1230_v39  ;;  %v1366_v9 = vsel %vm3680_vm10, %v1232_v40, %v1365_v33  ;;  %v1024_v37 = vmax.f32 %v992_v42, 0.0  ;;  %v993_v55 = vadd.f32 %v3851_v50, %v949_v43 }
 0x15d   : > { %1367 = vst [vmem:[#allocation3 + $0x48] sm:$0x11] %v1366_v9  ;;  %v1236_v18 = vrot.slane %v1234_v17, 7  ;;  %v2957_v12 = vpack.c.bf16 %v1023_v45, %v1022_v23  ;;  %v950_v14 = vadd.f32 %v897_v3, %v3907_v19  ;;  %v899_v1 = vpop.f32.mrf.mxu0  ;;  %v1474_v57 = vrot.slane %v1472_v20, 5 }
 0x15e   : > { %v1025_v22 = vmax.f32 %v993_v55, 0.0  ;;  %v951_v2 = vadd.f32 %v899_v1, %v3911_v21  ;;  %v1476_v10 = vshrl.u32 %v3974_v56, 16  ;;  %v1482_v11 = vshll.u32 %v4020_v47, 16 }
 0x15f   : > { %v1239_v0 = vor.u32 %v1237_v54, %v1236_v18  ;;  %v1240_v19 = vrot.slane %v1236_v18, 4  ;;  %v1242_v15 = vshrl.u32 %v2957_v12, 16  ;;  %v1245_v16 = vshll.u32 %v2957_v12, 16  ;;  %v903_v5 = vpop.f32.mrf.mxu0  ;;  %v1375_v12 = vld [vmem:[#allocation3 + $0x70] sm:$0xff] }
 0x160   : > { %v2958_v20 = vpack.c.bf16 %v1025_v22, %v1024_v37  ;;  %v994_v28 = vadd.f32 %v3847_v59, %v950_v14  ;;  %v995_v21 = vadd.f32 %v3851_v50, %v951_v2  ;;  %v952_v29 = vadd.f32 %v903_v5, %v3915_v26 }
 0x161   : > { %v4046_v62 = vsel %vm3698_vm2, %v1239_v0, %v1368_v4  ;;  %v1244_v33 = vrot.slane %v1242_v15, 7  ;;  %v1475_v13 = vsel %vm4035_vm7, %v1470_v48, %v1474_v57  ;;  %v1478_v23 = vrot.slane %v1476_v10, 4  ;;  %v905_v7 = vpop.f32.mrf.mxu0 }
 0x162   : > { %1370 = vst [vmem:[#allocation3 + $0x28] sm:$0xff] %v4046_v62  ;;  %v1251_v38 = vshrl.u32 %v2958_v20, 16  ;;  %v1254_v39 = vshll.u32 %v2958_v20, 16  ;;  %v1026_v40 = vmax.f32 %v994_v28, 0.0  ;;  %v1027_v42 = vmax.f32 %v995_v21, 0.0 }
 0x163   : > { %v1247_v43 = vor.u32 %v1245_v16, %v1244_v33  ;;  %v1249_v17 = vrot.slane %v1244_v33, 4  ;;  %v996_v26 = vadd.f32 %v3847_v59, %v952_v29  ;;  %v1479_v54 = vor.u32 %v1478_v23, %v1474_v57  ;;  %v907_v45 = vpop.f32.mrf.mxu0  ;;  %v3300_v29 = vld [vmem:[#allocation4 + $0x138] sm:$0xff]   ;;  %v1379_v33 = vld [vmem:[#allocation3 + $0xa8] sm:$0x11] }
 0x164   : > { %v1253_v3 = vrot.slane %v1251_v38, 7  ;;  %v2959_v9 = vpack.c.bf16 %v1027_v42, %v1026_v40  ;;  %v1484_v37 = vrot.slane %v1482_v11, 5  ;;  %v2873_v48 = vcombine.low %v3990_v63, %v4000_v60 }
 0x165   : > { %v4056_v55 = vsel %vm3965_vm5, %v1240_v19, %v1247_v43  ;;  %v1373_v18 = vsel %vm3680_vm10, %v1249_v17, %v1372_v36  ;;  %v1028_v14 = vmax.f32 %v996_v26, 0.0  ;;  %v1480_v1 = vrot.slane %v1479_v54, 4  ;;  %v909_v4 = vpop.f32.mrf.mxu0  ;;  %v3301_v36 = vld [vmem:[#allocation4 + $0x170] sm:$0xff]   ;;  %v4079_v54 = vld [vmem:[#allocation3 + $0x38] sm:$0x11] }
 0x166   : > { %1374 = vst [vmem:[#allocation3 + $0x50] sm:$0x11] %v1373_v18  ;;  %v1256_v57 = vor.u32 %v1254_v39, %v1253_v3  ;;  %v1257_v22 = vrot.slane %v1253_v3, 4  ;;  %v1259_v2 = vshrl.u32 %v2959_v9, 16  ;;  %v1262_v10 = vshll.u32 %v2959_v9, 16  ;;  %2161 = vmatmul.mubr.bf16.gmra.mxu0 %v2873_v48  ;;  %v3302_v48 = vld [vmem:[#allocation4 + $0x130] sm:$0xff]  }
 0x167   : > { %v1485_v11 = vsel %vm4035_vm7, %v1480_v1, %v1484_v37  ;;  %v953_v0 = vadd.f32 %v905_v7, %v3920_v30  ;;  %v954_v19 = vadd.f32 %v907_v45, %v3924_v31  ;;  %v955_v15 = vadd.f32 %v909_v4, %v3928_v32  ;;  %v913_v16 = vpop.f32.mrf.mxu0 }
 0x168   : > { %v4067_v5 = vsel %vm3698_vm2, %v1256_v57, %v1375_v12  ;;  %v1261_v20 = vrot.slane %v1259_v2, 7  ;;  %v2839_v28 = vcombine.low %v1475_v13, %v1485_v11  ;;  %v2840_v21 = vcombine.high %v1475_v13, %v1485_v11 }
 0x169   : > { %1377 = vst [vmem:[#allocation3 + $0x70] sm:$0xff] %v4067_v5  ;;  %v997_v23 = vadd.f32 %v3851_v50, %v953_v0  ;;  %v998_v30 = vadd.f32 %v3847_v59, %v954_v19  ;;  %v999_v31 = vadd.f32 %v3851_v50, %v955_v15  ;;  %v956_v32 = vadd.f32 %v913_v16, %v3932_v34  ;;  %v915_v7 = vpop.f32.mrf.mxu0 }
 0x16a   : > { %v1264_v38 = vor.u32 %v1262_v10, %v1261_v20  ;;  %v1266_v39 = vrot.slane %v1261_v20, 4  ;;  %1879 = vmatprep.mubr.bf16.mxu1 %v2840_v21  ;;  %v1511_v40 = vshrl.u32 %v4010_v58, 16  ;;  %v1514_v13 = vshll.u32 %v4010_v58, 16  ;;  %v3304_v21 = vld [vmem:[#allocation4 + $0x128] sm:$0xff]  }
 0x16b   : > { %v1029_v42 = vmax.f32 %v997_v23, 0.0  ;;  %1880 = vmatmul.mubr.bf16.vlgmr.msra.gmra.mxu1 %v2839_v28  ;;  %v1030_v43 = vmax.f32 %v998_v30, 0.0  ;;  %v1031_v17 = vmax.f32 %v999_v31, 0.0  ;;  %v4077_v26 = vadd.f32 %v3847_v59, %v956_v32  ;;  %v917_v45 = vpop.f32.mrf.mxu0  ;;  %v3305_v31 = vld [vmem:[#allocation4 + $0x160] sm:$0xff]   ;;  %v1382_v32 = vld [vmem:[#allocation3 + $0x78] sm:$0xff] }
 0x16c   : > { %v4083_v34 = vsel %vm3965_vm5, %v1257_v22, %v1264_v38  ;;  %v1380_v3 = vsel %vm3680_vm10, %v1266_v39, %v1379_v33  ;;  %3096 = vmatpush3.bf16.msra.mxu1 %v3300_v29  ;;  %v2876_v9 = vcombine.high %v4010_v58, %v4024_v49  ;;  %v1489_v37 = vrot.slane %v1487_v25, 4  ;;  %v3303_v22 = vld [vmem:[#allocation4 + $0x168] sm:$0xff]  }
 0x16d   : > { %1381 = vst [vmem:[#allocation3 + $0xa8] sm:$0x11] %v1380_v3  ;;  %v2960_v18 = vpack.c.bf16 %v1029_v42, %v1028_v14  ;;  %v2961_v12 = vpack.c.bf16 %v1031_v17, %v1030_v43  ;;  %v1032_v1 = vmax.f32 %v4077_v26, 0.0  ;;  %v1492_v4 = vrot.slane %v1490_v24, 5  ;;  %3097 = vmatprep.subr.bf16.mxu1 %v3301_v36  ;;  %v919_v57 = vpop.f32.mrf.mxu0  ;;  %v1386_v36 = vld [vmem:[#allocation3 + $0x40] sm:$0x11] }
 0x16e   : > { %2168 = vmatprep.mubr.bf16.mxu0 %v2876_v9  ;;  %v1496_v2 = vshll.u32 %v4000_v60, 16  ;;  %v1500_v10 = vshrl.u32 %v4000_v60, 16  ;;  %v1506_v11 = vshll.u32 %v4079_v54, 16  ;;  %v2875_v25 = vcombine.low %v4010_v58, %v4024_v49 }
 0x16f   : > { %v1268_v14 = vshrl.u32 %v2960_v18, 16  ;;  %v1271_v0 = vshll.u32 %v2960_v18, 16  ;;  %v1276_v19 = vshrl.u32 %v2961_v12, 16  ;;  %v1279_v15 = vshll.u32 %v2961_v12, 16  ;;  %v923_v16 = vpop.f32.mrf.mxu0  ;;  %v3306_v18 = vld [vmem:[#allocation4 + $0x120] sm:$0xff]  }
 0x170   : > { %v1493_v63 = vor.u32 %v1492_v4, %v1489_v37  ;;  %v1498_v24 = vrot.slane %v1496_v2, 5  ;;  %v1502_v20 = vrot.slane %v1500_v10, 4  ;;  %v1508_v28 = vrot.slane %v1506_v11, 5  ;;  %2169 = vmatmul.mubr.bf16.gmra.mxu0 %v2875_v25  ;;  %3098 = vmatpush3.bf16.msra.mxu1 %v3302_v48 }
 0x171   : > { %v1270_v29 = vrot.slane %v1268_v14, 7  ;;  %v1278_v33 = vrot.slane %v1276_v19, 7  ;;  %v957_v23 = vadd.f32 %v915_v7, %v3937_v41  ;;  %v958_v30 = vadd.f32 %v917_v45, %v3941_v44  ;;  %3099 = vmatprep.subr.bf16.mxu1 %v3303_v22  ;;  %v925_v48 = vpop.f32.mrf.mxu0 }
 0x172   : > { %v1494_v38 = vrot.slane %v1493_v63, 4  ;;  %v1503_v39 = vor.u32 %v1502_v20, %v1498_v24  ;;  %v959_v42 = vadd.f32 %v919_v57, %v3944_v46  ;;  %v960_v43 = vadd.f32 %v923_v16, %v3947_v52  ;;  %v3307_v57 = vld [vmem:[#allocation4 + $0x158] sm:$0xff]  }
 0x173   : > { %v1273_v17 = vor.u32 %v1271_v0, %v1270_v29  ;;  %v1274_v3 = vrot.slane %v1270_v29, 4  ;;  %v1281_v9 = vor.u32 %v1279_v15, %v1278_v33  ;;  %v1283_v37 = vrot.slane %v1278_v33, 4  ;;  %v4125_v15 = vld [vmem:[#allocation3 + $0x48] sm:$0x11]  ;;  %v927_v16 = vpop.f32.mrf.mxu0 }
 0x174   : > { %v1499_v41 = vsel %vm4035_vm7, %v1494_v38, %v1498_v24  ;;  %v1504_v7 = vrot.slane %v1503_v39, 4  ;;  %v1001_v44 = vadd.f32 %v3851_v50, %v957_v23  ;;  %v1002_v45 = vadd.f32 %v3847_v59, %v958_v30  ;;  %3100 = vmatpush3.bf16.msra.mxu1 %v3304_v21  ;;  %v3308_v21 = vld [vmem:[#allocation4 + $0x118] sm:$0xff]  }
 0x175   : > { %v4109_v46 = vsel %vm3698_vm2, %v1273_v17, %v1382_v32  ;;  %v4113_v52 = vsel %vm3965_vm5, %v1274_v3, %v1281_v9  ;;  %v1387_v12 = vsel %vm3680_vm10, %v1283_v37, %v1386_v36  ;;  %v1003_v4 = vadd.f32 %v3851_v50, %v959_v42  ;;  %3101 = vmatprep.subr.bf16.mxu1 %v3305_v31  ;;  %v3310_v9 = vld [vmem:[#allocation4 + $0x110] sm:$0xff]  }
 0x176   : > { %1384 = vst [vmem:[#allocation3 + $0x78] sm:$0xff] %v4109_v46  ;;  %1388 = vst [vmem:[#allocation3 + $0x40] sm:$0x11] %v1387_v12  ;;  %v1509_v22 = vsel %vm4035_vm7, %v1504_v7, %v1508_v28  ;;  %v1033_v2 = vmax.f32 %v1001_v44, 0.0  ;;  %v1034_v10 = vmax.f32 %v1002_v45, 0.0  ;;  %v4122_v11 = vadd.f32 %v3847_v59, %v960_v43  ;;  %v1389_v37 = vld [vmem:[#allocation3 + $0x10] sm:$0xff] }
 0x177   : > { %v2842_v25 = vcombine.high %v1499_v41, %v1509_v22  ;;  %v2841_v14 = vcombine.low %v1499_v41, %v1509_v22  ;;  %v1035_v0 = vmax.f32 %v1003_v4, 0.0  ;;  %v1535_v19 = vshrl.u32 %v4046_v62, 16 }
 0x178   : > { %v2962_v63 = vpack.c.bf16 %v1033_v2, %v1032_v1  ;;  %v1036_v24 = vmax.f32 %v4122_v11, 0.0  ;;  %v1538_v20 = vshll.u32 %v4046_v62, 16  ;;  %v2878_v28 = vcombine.high %v4046_v62, %v4056_v55  ;;  %3102 = vmatpush3.bf16.msra.mxu1 %v3306_v18  ;;  %v3309_v1 = vld [vmem:[#allocation4 + $0x150] sm:$0xff]   ;;  %v3311_v18 = vld [vmem:[#allocation4 + $0x148] sm:$0xff]  }
 0x179   : > { %1887 = vmatprep.mubr.bf16.mxu1 %v2842_v25  ;;  %v2963_v29 = vpack.c.bf16 %v1035_v0, %v1034_v10  ;;  %v1513_v33 = vrot.slane %v1511_v40, 4  ;;  %v1516_v23 = vrot.slane %v1514_v13, 5  ;;  %v1520_v26 = vshll.u32 %v4024_v49, 16  ;;  %3103 = vmatprep.subr.bf16.mxu1 %v3307_v57  ;;  %v929_v40 = vpop.f32.mrf.mxu0  ;;  %v1393_v57 = vld [vmem:[#allocation3 + $0xa0] sm:$0x11] }
 0x17a   : > { %v1285_v30 = vshrl.u32 %v2962_v63, 16  ;;  %v1288_v31 = vshll.u32 %v2962_v63, 16  ;;  %1888 = vmatmul.mubr.bf16.gmra.mxu1 %v2841_v14  ;;  %2176 = vmatprep.mubr.bf16.mxu0 %v2878_v28  ;;  %v1524_v32 = vshrl.u32 %v4024_v49, 16  ;;  %v1530_v36 = vshll.u32 %v4125_v15, 16  ;;  %v3312_v63 = vld [vmem:[#allocation4 + $0x108] sm:$0xff]  }
 0x17b   : > { %v1293_v38 = vshrl.u32 %v2963_v29, 16  ;;  %v1296_v39 = vshll.u32 %v2963_v29, 16  ;;  %v1517_v42 = vor.u32 %v1516_v23, %v1513_v33  ;;  %v1522_v43 = vrot.slane %v1520_v26, 5  ;;  %v4165_v26 = vld [vmem:[#allocation3 + $0x50] sm:$0x11] }
 0x17c   : > { %v1287_v17 = vrot.slane %v1285_v30, 7  ;;  %v1526_v58 = vrot.slane %v1524_v32, 4  ;;  %v1532_v13 = vrot.slane %v1530_v36, 5  ;;  %v2877_v3 = vcombine.low %v4046_v62, %v4056_v55  ;;  %3104 = vmatpush3.bf16.msra.mxu1 %v3308_v21 }
 0x17d   : > { %v1295_v41 = vrot.slane %v1293_v38, 7  ;;  %v1518_v7 = vrot.slane %v1517_v42, 4  ;;  %v961_v44 = vadd.f32 %v925_v48, %v3950_v51  ;;  %v962_v45 = vadd.f32 %v927_v16, %v3953_v61  ;;  %3105 = vmatprep.subr.bf16.mxu1 %v3309_v1  ;;  %v3313_v1 = vld [vmem:[#allocation4 + $0x140] sm:$0xff]  }
 0x17e   : > { %v1290_v12 = vor.u32 %v1288_v31, %v1287_v17  ;;  %v1291_v4 = vrot.slane %v1287_v17, 4  ;;  %v1527_v22 = vor.u32 %v1526_v58, %v1522_v43  ;;  %2177 = vmatmul.mubr.bf16.gmra.mxu0 %v2877_v3  ;;  %v963_v2 = vadd.f32 %v929_v40, %v3957_v53  ;;  %v3314_v40 = vld [vmem:[#allocation4 + $0x100] sm:$0xff]  }
 0x17f   : > { %v1298_v10 = vor.u32 %v1296_v39, %v1295_v41  ;;  %v1300_v25 = vrot.slane %v1295_v41, 4  ;;  %v1523_v14 = vsel %vm4035_vm7, %v1518_v7, %v1522_v43  ;;  %v1005_v0 = vadd.f32 %v3851_v50, %v961_v44  ;;  %v1396_v7 = vld [vmem:[#allocation3 + $0xb8] sm:$0xff] }
 0x180   : > { %v4150_v51 = vsel %vm3698_vm2, %v1290_v12, %v1389_v37  ;;  %v1528_v61 = vrot.slane %v1527_v22, 4  ;;  %v1006_v48 = vadd.f32 %v3847_v59, %v962_v45  ;;  %v1007_v16 = vadd.f32 %v3851_v50, %v963_v2  ;;  %3106 = vmatpush3.bf16.msra.mxu1 %v3310_v9  ;;  %v1400_v22 = vld [vmem:[#allocation3 + $0x68] sm:$0x11] }
 0x181   : > { %1391 = vst [vmem:[#allocation3 + $0x10] sm:$0xff] %v4150_v51  ;;  %v4157_v53 = vsel %vm3965_vm5, %v1291_v4, %v1298_v10  ;;  %v1394_v28 = vsel %vm3680_vm10, %v1300_v25, %v1393_v57  ;;  %v1037_v21 = vmax.f32 %v1005_v0, 0.0  ;;  %v1559_v29 = vshrl.u32 %v4067_v5, 16  ;;  %3107 = vmatprep.subr.bf16.mxu1 %v3311_v18  ;;  %v4184_v25 = vld [vmem:[#allocation3 + $0xa8] sm:$0x11] }
 0x182   : > { %1395 = vst [vmem:[#allocation3 + $0xa0] sm:$0x11] %v1394_v28  ;;  %v1533_v59 = vsel %vm4035_vm7, %v1528_v61, %v1532_v13  ;;  %v1038_v50 = vmax.f32 %v1006_v48, 0.0  ;;  %v1039_v33 = vmax.f32 %v1007_v16, 0.0  ;;  %v1562_v23 = vshll.u32 %v4067_v5, 16 }
 0x183   : > { %v2844_v30 = vcombine.high %v1523_v14, %v1533_v59  ;;  %v2964_v31 = vpack.c.bf16 %v1037_v21, %v1036_v24  ;;  %v2843_v32 = vcombine.low %v1523_v14, %v1533_v59  ;;  %v2880_v36 = vcombine.high %v4067_v5, %v4083_v34 }
 0x184   : > { %v2965_v38 = vpack.c.bf16 %v1039_v33, %v1038_v50  ;;  %v1537_v39 = vrot.slane %v1535_v19, 4  ;;  %v1540_v42 = vrot.slane %v1538_v20, 5  ;;  %v1544_v43 = vshll.u32 %v4056_v55, 16  ;;  %3108 = vmatpush3.bf16.msra.mxu1 %v3312_v63 }
 0x185   : > { %1895 = vmatprep.mubr.bf16.mxu1 %v2844_v30  ;;  %v1302_v17 = vshrl.u32 %v2964_v31, 16  ;;  %v1305_v58 = vshll.u32 %v2964_v31, 16  ;;  %2184 = vmatprep.mubr.bf16.mxu0 %v2880_v36  ;;  %v1548_v11 = vshrl.u32 %v4056_v55, 16  ;;  %v1554_v24 = vshll.u32 %v4165_v26, 16  ;;  %v4206_v36 = vld [vmem:[#allocation3 + $0x40] sm:$0x11] }
 0x186   : > { %1896 = vmatmul.mubr.bf16.gmra.mxu1 %v2843_v32  ;;  %v1310_v13 = vshrl.u32 %v2965_v38, 16  ;;  %v1313_v3 = vshll.u32 %v2965_v38, 16  ;;  %v1541_v9 = vor.u32 %v1540_v42, %v1537_v39  ;;  %v1546_v19 = vrot.slane %v1544_v43, 5  ;;  %3109 = vmatprep.subr.bf16.mxu1 %v3313_v1 }
 0x187   : > { %v1304_v62 = vrot.slane %v1302_v17, 7  ;;  %v1550_v20 = vrot.slane %v1548_v11, 4  ;;  %v1556_v37 = vrot.slane %v1554_v24, 5  ;;  %v2879_v41 = vcombine.low %v4067_v5, %v4083_v34 }
 0x188   : > { %v1312_v44 = vrot.slane %v1310_v13, 7  ;;  %v1542_v45 = vrot.slane %v1541_v9, 4  ;;  %v1583_v18 = vshrl.u32 %v4109_v46, 16  ;;  %v1586_v12 = vshll.u32 %v4109_v46, 16  ;;  %3110 = vmatpush3.bf16.msra.mxu1 %v3314_v40 }
 0x189   : > { %v1307_v4 = vor.u32 %v1305_v58, %v1304_v62  ;;  %v1308_v57 = vrot.slane %v1304_v62, 4  ;;  %v1551_v2 = vor.u32 %v1550_v20, %v1546_v19  ;;  %2185 = vmatmul.mubr.bf16.gmra.mxu0 %v2879_v41  ;;  %v2882_v10 = vcombine.high %v4109_v46, %v4113_v52 }
 0x18a   : > { %v1315_v14 = vor.u32 %v1313_v3, %v1312_v44  ;;  %v1317_v5 = vrot.slane %v1312_v44, 4  ;;  %v1547_v0 = vsel %vm4035_vm7, %v1542_v45, %v1546_v19  ;;  %v1561_v61 = vrot.slane %v1559_v29, 4  ;;  %v4223_v44 = vld [vmem:[#allocation3 + $0xa0] sm:$0x11] }
 0x18b   : > { %v4190_v48 = vsel %vm3698_vm2, %v1307_v4, %v1396_v7  ;;  %v1552_v16 = vrot.slane %v1551_v2, 4  ;;  %2192 = vmatprep.mubr.bf16.mxu0 %v2882_v10  ;;  %v1564_v63 = vrot.slane %v1562_v23, 5  ;;  %v1568_v28 = vshll.u32 %v4083_v34, 16 }
 0x18c   : > { %1398 = vst [vmem:[#allocation3 + $0xb8] sm:$0xff] %v4190_v48  ;;  %v4196_v21 = vsel %vm3965_vm5, %v1308_v57, %v1315_v14  ;;  %v1401_v59 = vsel %vm3680_vm10, %v1317_v5, %v1400_v22  ;;  %v1572_v29 = vshrl.u32 %v4083_v34, 16  ;;  %v1578_v27 = vshll.u32 %v4184_v25, 16  ;;  %vm4255_vm10 = vmor %vm2241_vm8, %vm2242_vm9 }
 0x18d   : > { %1402 = vst [vmem:[#allocation3 + $0x68] sm:$0x11] %v1401_v59  ;;  %v1557_v50 = vsel %vm4035_vm7, %v1552_v16, %v1556_v37  ;;  %v1565_v33 = vor.u32 %v1564_v63, %v1561_v61  ;;  %v1570_v23 = vrot.slane %v1568_v28, 5  ;;  %v2881_v1 = vcombine.low %v4109_v46, %v4113_v52 }
 0x18e   : > { %v2846_v30 = vcombine.high %v1547_v0, %v1557_v50  ;;  %v2845_v35 = vcombine.low %v1547_v0, %v1557_v50  ;;  %v1574_v31 = vrot.slane %v1572_v29, 4  ;;  %v1580_v32 = vrot.slane %v1578_v27, 5 }
 0x18f   : > { %v1566_v6 = vrot.slane %v1565_v33, 4  ;;  %v1607_v38 = vshrl.u32 %v4150_v51, 16  ;;  %v1610_v39 = vshll.u32 %v4150_v51, 16  ;;  %v2884_v42 = vcombine.high %v4150_v51, %v4157_v53 }
 0x190   : > { %1903 = vmatprep.mubr.bf16.mxu1 %v2846_v30  ;;  %v1575_v43 = vor.u32 %v1574_v31, %v1570_v23  ;;  %v1585_v40 = vrot.slane %v1583_v18, 4  ;;  %v1588_v17 = vrot.slane %v1586_v12, 5  ;;  %v1592_v46 = vshll.u32 %v4113_v52, 16 }
 0x191   : > { %1904 = vmatmul.mubr.bf16.gmra.mxu1 %v2845_v35  ;;  %v1571_v58 = vsel %vm4035_vm7, %v1566_v6, %v1570_v23  ;;  %2193 = vmatmul.mubr.bf16.gmra.mxu0 %v2881_v1  ;;  %v1596_v11 = vshrl.u32 %v4113_v52, 16  ;;  %v1602_v24 = vshll.u32 %v4206_v36, 16  ;;  %v2883_v13 = vcombine.low %v4150_v51, %v4157_v53 }
 0x192   : > { %v1576_v3 = vrot.slane %v1575_v43, 4  ;;  %2200 = vmatprep.mubr.bf16.mxu0 %v2884_v42  ;;  %v1589_v9 = vor.u32 %v1588_v17, %v1585_v40  ;;  %v1594_v19 = vrot.slane %v1592_v46, 5  ;;  %v1631_v62 = vshrl.u32 %v4190_v48, 16 }
 0x193   : > { %v1598_v20 = vrot.slane %v1596_v11, 4  ;;  %v1604_v37 = vrot.slane %v1602_v24, 5  ;;  %v1634_v41 = vshll.u32 %v4190_v48, 16  ;;  %v2886_v7 = vcombine.high %v4190_v48, %v4196_v21 }
 0x194   : > { %v1581_v45 = vsel %vm4035_vm7, %v1576_v3, %v1580_v32  ;;  %v1590_v18 = vrot.slane %v1589_v9, 4  ;;  %v1609_v51 = vrot.slane %v1607_v38, 4  ;;  %v1612_v12 = vrot.slane %v1610_v39, 5  ;;  %v4232_v61 = vld [vmem:[#allocation3 + $0x68] sm:$0x11] }
 0x195   : > { %v2848_v4 = vcombine.high %v1571_v58, %v1581_v45  ;;  %v2847_v57 = vcombine.low %v1571_v58, %v1581_v45  ;;  %v1599_v22 = vor.u32 %v1598_v20, %v1594_v19  ;;  %v1616_v2 = vshll.u32 %v4157_v53, 16 }
 0x196   : > { %v1595_v10 = vsel %vm4035_vm7, %v1590_v18, %v1594_v19  ;;  %v1613_v14 = vor.u32 %v1612_v12, %v1609_v51  ;;  %v1620_v5 = vshrl.u32 %v4157_v53, 16  ;;  %v1626_v0 = vshll.u32 %v4223_v44, 16  ;;  %v2217_v18 = vld [vmem:[#allocation3 + $0x98] sm:$0xee] }
 0x197   : > { %1911 = vmatprep.mubr.bf16.mxu1 %v2848_v4  ;;  %v1600_v16 = vrot.slane %v1599_v22, 4  ;;  %v1618_v63 = vrot.slane %v1616_v2, 5  ;;  %v2885_v28 = vcombine.low %v4190_v48, %v4196_v21  ;;  %v1633_v59 = vrot.slane %v1631_v62, 4 }
 0x198   : > { %v1614_v29 = vrot.slane %v1613_v14, 4  ;;  %v1622_v27 = vrot.slane %v1620_v5, 4  ;;  %v1628_v50 = vrot.slane %v1626_v0, 5  ;;  %v1636_v33 = vrot.slane %v1634_v41, 5  ;;  %v2223_v41 = vld [vmem:[#allocation3 + $0x10] sm:$0xee] }
 0x199   : > { %1912 = vmatmul.mubr.bf16.gmra.mxu1 %v2847_v57  ;;  %v1605_v23 = vsel %vm4035_vm7, %v1600_v16, %v1604_v37  ;;  %2201 = vmatmul.mubr.bf16.gmra.mxu0 %v2883_v13  ;;  %v1640_v1 = vshll.u32 %v4196_v21, 16  ;;  %v1644_v30 = vshrl.u32 %v4196_v21, 16  ;;  %v1650_v35 = vshll.u32 %v4232_v61, 16  ;;  %v2222_v37 = vld [vmem:[#allocation3 + $0x78] sm:$0xee] }
 0x19a   : > { %v2850_v31 = vcombine.high %v1595_v10, %v1605_v23  ;;  %v2849_v32 = vcombine.low %v1595_v10, %v1605_v23  ;;  %2208 = vmatprep.mubr.bf16.mxu0 %v2886_v7  ;;  %v1619_v48 = vsel %vm4035_vm7, %v1614_v29, %v1618_v63  ;;  %v1623_v6 = vor.u32 %v1622_v27, %v1618_v63  ;;  %v2218_v23 = vld [vmem:[#allocation3] sm:$0xee] }
 0x19b   : > { %v1637_v38 = vor.u32 %v1636_v33, %v1633_v59  ;;  %v1642_v39 = vrot.slane %v1640_v1, 5  ;;  %v1646_v42 = vrot.slane %v1644_v30, 4  ;;  %v1652_v46 = vrot.slane %v1650_v35, 5 }
 0x19c   : > { %1919 = vmatprep.mubr.bf16.mxu1 %v2850_v31  ;;  %v1624_v43 = vrot.slane %v1623_v6, 4  ;;  %v2246_v20 = vrot.slane %v3974_v56, 5  ;;  %v2249_v7 = vrot.slane %v4020_v47, 5  ;;  %v2281_v45 = vrot.slane %v4113_v52, 5  ;;  %v2224_v56 = vld [vmem:[#allocation3 + $0xb8] sm:$0xee] }
 0x19d   : > { %v1638_v40 = vrot.slane %v1637_v38, 4  ;;  %v1647_v17 = vor.u32 %v1646_v42, %v1642_v39  ;;  %v2908_v51 = vrot.slane %v2222_v37, 9  ;;  %v2284_v12 = vrot.slane %v4206_v36, 5 }
 0x19e   : > { %v1629_v58 = vsel %vm4035_vm7, %v1624_v43, %v1628_v50  ;;  %v2288_v8 = vrot.slane %v4157_v53, 5  ;;  %v2248_v4 = vrot.slane %v2246_v20, 4  ;;  %v2909_v57 = vrot.slane %v2223_v41, 9 }
 0x19f   : > { %v2852_v11 = vcombine.high %v1619_v48, %v1629_v58  ;;  %v2851_v24 = vcombine.low %v1619_v48, %v1629_v58  ;;  %v1643_v13 = vsel %vm4035_vm7, %v1638_v40, %v1642_v39  ;;  %v1648_v3 = vrot.slane %v1647_v17, 4  ;;  %v2219_v40 = vld [vmem:[#allocation3 + $0x30] sm:$0xee] }
 0x1a0   : > { %v2291_v22 = vrot.slane %v4223_v44, 5  ;;  %v2283_v47 = vrot.slane %v2281_v45, 4  ;;  %v2903_v10 = vrot.slane %v2217_v18, 9  ;;  %v2250_v52 = vsel %vm4255_vm10, %v2248_v4, %v2249_v7 }
 0x1a1   : > { %1920 = vmatmul.mubr.bf16.gmra.mxu1 %v2849_v32  ;;  %2209 = vmatmul.mubr.bf16.gmra.mxu0 %v2885_v28  ;;  %v1653_v9 = vsel %vm4035_vm7, %v1648_v3, %v1652_v46  ;;  %v2290_v14 = vrot.slane %v2288_v8, 4  ;;  %v2295_v36 = vrot.slane %v4196_v21, 5  ;;  %v4264_v53 = vsel %vm4255_vm10, %v2908_v51, %v2281_v45  ;;  %v2221_v45 = vld [vmem:[#allocation3 + $0x70] sm:$0xee] }
 0x1a2   : > { %1927 = vmatprep.mubr.bf16.mxu1 %v2852_v11  ;;  %v2854_v19 = vcombine.high %v1643_v13, %v1653_v9  ;;  %v2853_v62 = vcombine.low %v1643_v13, %v1653_v9  ;;  %v4268_v44 = vsel %vm4255_vm10, %v2283_v47, %v2284_v12  ;;  %v2910_v5 = vrot.slane %v2224_v56, 9  ;;  %v2220_v9 = vld [vmem:[#allocation3 + $0x28] sm:$0xee] }
 0x1a3   : > { %v2298_v0 = vrot.slane %v4232_v61, 5  ;;  %v2922_v16 = vcombine.high %v4264_v53, %v4268_v44  ;;  %v2921_v63 = vcombine.low %v4264_v53, %v4268_v44  ;;  %v2289_v21 = vsel %vm4255_vm10, %v2909_v57, %v2288_v8 }
 0x1a4   : > { %v2292_v28 = vsel %vm4255_vm10, %v2290_v14, %v2291_v22  ;;  %v2297_v27 = vrot.slane %v2295_v36, 4  ;;  %v2247_v50 = vsel %vm4255_vm10, %v2903_v10, %v2246_v20  ;;  %v2253_v61 = vrot.slane %v4000_v60, 5 }
 0x1a5   : > { %v2924_v59 = vcombine.high %v2289_v21, %v2292_v28  ;;  %v2923_v29 = vcombine.low %v2289_v21, %v2292_v28  ;;  %v2912_v33 = vcombine.high %v2247_v50, %v2250_v52  ;;  %v2296_v1 = vsel %vm4255_vm10, %v2910_v5, %v2295_v36 }
 0x1a6   : > { %v2299_v30 = vsel %vm4255_vm10, %v2297_v27, %v2298_v0  ;;  %v2256_v35 = vrot.slane %v4079_v54, 5  ;;  %v2904_v48 = vrot.slane %v2218_v23, 9  ;;  %v2255_v6 = vrot.slane %v2253_v61, 4 }
 0x1a7   : > { %v2926_v31 = vcombine.high %v2296_v1, %v2299_v30  ;;  %v2925_v32 = vcombine.low %v2296_v1, %v2299_v30  ;;  %v2911_v60 = vcombine.low %v2247_v50, %v2250_v52  ;;  %v2260_v42 = vrot.slane %v4024_v49, 5 }
 0x1a8   : > { %v2257_v38 = vsel %vm4255_vm10, %v2255_v6, %v2256_v35  ;;  %v2254_v39 = vsel %vm4255_vm10, %v2904_v48, %v2253_v61  ;;  %v2263_v17 = vrot.slane %v4125_v15, 5  ;;  %v2905_v54 = vrot.slane %v2219_v40, 9 }
 0x1a9   : > { %1928 = vmatmul.mubr.bf16.gmra.mxu1 %v2851_v24  ;;  %v2914_v43 = vcombine.high %v2254_v39, %v2257_v38  ;;  %v2262_v46 = vrot.slane %v2260_v42, 4  ;;  %v2913_v11 = vcombine.low %v2254_v39, %v2257_v38  ;;  %v2267_v13 = vrot.slane %v4056_v55, 5 }
 0x1aa   : > { %1935 = vmatprep.mubr.bf16.mxu1 %v2854_v19  ;;  %v2261_v24 = vsel %vm4255_vm10, %v2905_v54, %v2260_v42  ;;  %v2270_v49 = vrot.slane %v4165_v26, 5  ;;  %v2906_v19 = vrot.slane %v2220_v9, 9  ;;  %v2274_v41 = vrot.slane %v4083_v34, 5 }
 0x1ab   : > { %v2264_v58 = vsel %vm4255_vm10, %v2262_v46, %v2263_v17  ;;  %v2269_v15 = vrot.slane %v2267_v13, 4  ;;  %v2277_v55 = vrot.slane %v4184_v25, 5  ;;  %v2907_v18 = vrot.slane %v2221_v45, 9 }
 0x1ac   : > { %v2916_v3 = vcombine.high %v2261_v24, %v2264_v58  ;;  %v2915_v20 = vcombine.low %v2261_v24, %v2264_v58  ;;  %v2268_v37 = vsel %vm4255_vm10, %v2906_v19, %v2267_v13  ;;  %v2276_v26 = vrot.slane %v2274_v41, 4 }
 0x1ad   : > { %v2275_v8 = vsel %vm4255_vm10, %v2907_v18, %v2274_v41  ;;  %v4389_v18 = vld [vmem:[%s4526_s4] ss:$0 sm:$0xff] }
 0x1ae   : > { %v2278_v51 = vsel %vm4255_vm10, %v2276_v26, %v2277_v55 }
 0x1af   : > { %v2920_v4 = vcombine.high %v2275_v8, %v2278_v51  ;;  %v2919_v57 = vcombine.low %v2275_v8, %v2278_v51 }
 0x1b1   : > { %1936 = vmatmul.mubr.bf16.gmra.mxu1 %v2853_v62  ;;  %v2271_v62 = vsel %vm4255_vm10, %v2269_v15, %v2270_v49 }
 0x1b2   : > { %2525 = vmatprep.mubr.bf16.mxu1 %v2912_v33  ;;  %v2918_v7 = vcombine.high %v2268_v37, %v2271_v62  ;;  %v2917_v12 = vcombine.low %v2268_v37, %v2271_v62 }
 0x1b9   : > { %2526 = vmatmul.mubr.bf16.vlgmr.msra.gmra.mxu1 %v2911_v60 }
 0x1ba   : > { %2533 = vmatprep.mubr.bf16.mxu1 %v2914_v43 }
 0x1c1   : > { %2534 = vmatmul.mubr.bf16.gmra.mxu1 %v2913_v11 }
 0x1c2   : > { %2541 = vmatprep.mubr.bf16.mxu1 %v2916_v3 }
 0x1c9   : > { %2542 = vmatmul.mubr.bf16.gmra.mxu1 %v2915_v20 }
 0x1ca   : > { %2549 = vmatprep.mubr.bf16.mxu1 %v2918_v7 }
 0x1d1   : > { %2550 = vmatmul.mubr.bf16.gmra.mxu1 %v2917_v12 }
 0x1d2   : > { %2557 = vmatprep.mubr.bf16.mxu1 %v2920_v4 }
 0x1d9   : > { %2558 = vmatmul.mubr.bf16.gmra.mxu1 %v2919_v57 }
 0x1da   : > { %2565 = vmatprep.mubr.bf16.mxu1 %v2922_v16 }
 0x1e1   : > { %2566 = vmatmul.mubr.bf16.gmra.mxu1 %v2921_v63 }
 0x1e2   : > { %2573 = vmatprep.mubr.bf16.mxu1 %v2924_v59 }
 0x1e9   : > { %2574 = vmatmul.mubr.bf16.gmra.mxu1 %v2923_v29 }
 0x1ea   : > { %2581 = vmatprep.mubr.bf16.mxu1 %v2926_v31 }
 0x1f1   : > { %2582 = vmatmul.mubr.bf16.gmra.mxu1 %v2925_v32 }
 0x210   : > { %v3047_v47 = vpop.f32.mrf.mxu0 }
 0x212   : > { %v3048_v52 = vpop.f32.mrf.mxu0 }
 0x213   : > { %v3049_v20 = vadd.f32 %v3048_v52, %v3047_v47 }
 0x214   : > { %v3050_v36 = vpop.f32.mrf.mxu0 }
 0x216   : > { %v3051_v44 = vpop.f32.mrf.mxu0 }
 0x217   : > { %v3052_v51 = vadd.f32 %v3051_v44, %v3050_v36 }
 0x226   : > { %v3053_v0 = vpop.f32.mrf.mxu0 }
 0x228   : > { %v3054_v21 = vpop.f32.mrf.mxu0 }
 0x22a   : > { %v4321_v59 = vpop.f32.mrf.mxu0 }
 0x22b   : > { %v2983_v34 = vpop.f32.mrf.mxu1 }
 0x22c   : > { %v3057_v27 = vpop.f32.mrf.mxu0 }
 0x22d   : > { %v2984_v25 = vpop.f32.mrf.mxu1 }
 0x22e   : > { %v2985_v15 = vadd.f32 %v2984_v25, %v2983_v34 }
 0x22f   : > { %v2986_v22 = vpop.f32.mrf.mxu1 }
 0x230   : > { %v4329_v33 = vpop.f32.mrf.mxu0  ;;  %v2155_v7 = vadd.f32 %v3049_v20, %v2985_v15 }
 0x231   : > { %v2987_v56 = vpop.f32.mrf.mxu1 }
 0x232   : > { %v4335_v30 = vpop.f32.mrf.mxu0  ;;  %v2988_v45 = vadd.f32 %v2987_v56, %v2986_v22  ;;  %v3055_v56 = vadd.f32 %v3054_v21, %v3053_v0  ;;  %v3058_v0 = vadd.f32 %v3057_v27, %v4321_v59 }
 0x234   : > { %v4341_v32 = vpop.f32.mrf.mxu0  ;;  %v2158_v57 = vadd.f32 %v3052_v51, %v2988_v45 }
 0x236   : > { %v4347_v38 = vpop.f32.mrf.mxu0 }
 0x23a   : > { %v2989_v10 = vpop.f32.mrf.mxu1 }
 0x23c   : > { %v2990_v2 = vpop.f32.mrf.mxu1 }
 0x23d   : > { %v2991_v34 = vadd.f32 %v2990_v2, %v2989_v10 }
 0x23e   : > { %v4309_v14 = vpop.f32.mrf.mxu1  ;;  %v4353_v42 = vpop.f32.mrf.mxu0 }
 0x23f   : > { %v2163_v44 = vadd.f32 %v3055_v56, %v2991_v34 }
 0x240   : > { %v4311_v53 = vpop.f32.mrf.mxu1  ;;  %v4359_v17 = vpop.f32.mrf.mxu0 }
 0x242   : > { %v4365_v58 = vpop.f32.mrf.mxu0 }
 0x244   : > { %v4371_v13 = vpop.f32.mrf.mxu0 }
 0x246   : > { %v4313_v5 = vpop.f32.mrf.mxu1 }
 0x248   : > { %v4315_v16 = vpop.f32.mrf.mxu1 }
 0x249   : > { %v4377_v49 = vpop.f32.mrf.mxu0 }
 0x24a   : > { %v4317_v63 = vpop.f32.mrf.mxu1 }
 0x24b   : > { %v4382_v37 = vpop.f32.mrf.mxu0 }
 0x24c   : > { %v4319_v28 = vpop.f32.mrf.mxu1 }
 0x24d   : > { %v4391_v8 = vpop.f32.mrf.mxu0 }
 0x24f   : > { %v4397_v15 = vpop.f32.mrf.mxu0 }
 0x251   : > { %v4323_v29 = vpop.f32.mrf.mxu1 }
 0x253   : > { %v4325_v50 = vpop.f32.mrf.mxu1 }
 0x254   : > { %v3003_v56 = vadd.f32 %v4325_v50, %v4323_v29  ;;  %v3070_v50 = vadd.f32 %v4371_v13, %v4365_v58 }
 0x255   : > { %v4327_v61 = vpop.f32.mrf.mxu1 }
 0x257   : > { %v4331_v23 = vpop.f32.mrf.mxu1 }
 0x259   : > { %v4333_v1 = vpop.f32.mrf.mxu1 }
 0x25b   : > { %v4337_v35 = vpop.f32.mrf.mxu1 }
 0x25d   : > { %v4339_v31 = vpop.f32.mrf.mxu1 }
 0x25f   : > { %v4343_v48 = vpop.f32.mrf.mxu1 }
 0x261   : > { %v4345_v6 = vpop.f32.mrf.mxu1 }
 0x263   : > { %v4349_v60 = vpop.f32.mrf.mxu1 }
 0x265   : > { %v4351_v39 = vpop.f32.mrf.mxu1 }
 0x267   : > { %v4355_v43 = vpop.f32.mrf.mxu1 }
 0x269   : > { %v4357_v40 = vpop.f32.mrf.mxu1 }
 0x26b   : > { %v4361_v54 = vpop.f32.mrf.mxu1 }
 0x26d   : > { %v4363_v46 = vpop.f32.mrf.mxu1 }
 0x26f   : > { %v4367_v11 = vpop.f32.mrf.mxu1 }
 0x271   : > { %v4369_v24 = vpop.f32.mrf.mxu1 }
 0x273   : > { %v4373_v3 = vpop.f32.mrf.mxu1 }
 0x275   : > { %v4375_v9 = vpop.f32.mrf.mxu1 }
 0x277   : > { %v4379_v19 = vpop.f32.mrf.mxu1 }
 0x279   : > { %v3111_v62 = vpop.f32.mrf.mxu1 }
 0x27b   : > { %v3112_v41 = vpop.f32.mrf.mxu1 }
 0x27c   : > { %v3113_v55 = vadd.f32 %v3112_v41, %v3111_v62  ;;  %v2994_v62 = vadd.f32 %v4311_v53, %v4309_v14  ;;  %v4404_v41 = vpop.f32.mrf.mxu0  ;;  %v3061_v53 = vadd.f32 %v4335_v30, %v4329_v33 }
 0x27d   : > { %v3114_v26 = vpop.f32.mrf.mxu1 }
 0x27e   : > { %v2590_v12 = vadd.f32 %v3113_v55, %v2155_v7  ;;  %v2166_v45 = vadd.f32 %v3058_v0, %v2994_v62  ;;  %v2997_v55 = vadd.f32 %v4315_v16, %v4313_v5  ;;  %v3078_v59 = vpop.f32.mrf.mxu0  ;;  %v3064_v16 = vadd.f32 %v4347_v38, %v4341_v32 }
 0x27f   : > { %v3115_v4 = vpop.f32.mrf.mxu1 }
 0x280   : > { %v2613_v25 = vadd.f32 %v4389_v18, %v2590_v12  ;;  %v3116_v47 = vadd.f32 %v3115_v4, %v3114_v26  ;;  %v2171_v4 = vadd.f32 %v3061_v53, %v2997_v55 }
 0x281   : > { %v3117_v22 = vpop.f32.mrf.mxu1 }
 0x282   : > { %2629 = vst [vmem:[%s4394_s8] sm:$0xff] %v2613_v25  ;;  %v2591_v52 = vadd.f32 %v3116_v47, %v2158_v57  ;;  %v3000_v57 = vadd.f32 %v4319_v28, %v4317_v63  ;;  %v3067_v28 = vadd.f32 %v4359_v17, %v4353_v42 }
 0x283   : > { %v3118_v36 = vpop.f32.mrf.mxu1 }
 0x284   : > { %v2614_v10 = vadd.f32 %v4389_v18, %v2591_v52  ;;  %v3119_v2 = vadd.f32 %v3118_v36, %v3117_v22  ;;  %v3080_v22 = vpop.f32.mrf.mxu0  ;;  %v2174_v30 = vadd.f32 %v3064_v16, %v3000_v57  ;;  %v2179_v38 = vadd.f32 %v3067_v28, %v3003_v56 }
 0x285   : > { %v3120_v20 = vpop.f32.mrf.mxu1  ;;  %v3015_v57 = vadd.f32 %v4349_v60, %v4345_v6 }
 0x286   : > { %2630 = vst [vmem:[%s4394_s8 + $0x8] sm:$0xff] %v2614_v10  ;;  %v2592_v21 = vadd.f32 %v3119_v2, %v2163_v44  ;;  %v3081_v62 = vpop.f32.mrf.mxu0  ;;  %v3006_v10 = vadd.f32 %v4331_v23, %v4327_v61  ;;  %v3073_v23 = vadd.f32 %v4382_v37, %v4377_v49 }
 0x287   : > { %v3121_v7 = vpop.f32.mrf.mxu1  ;;  %v3082_v6 = vadd.f32 %v3081_v62, %v3080_v22  ;;  %v3024_v22 = vadd.f32 %v4367_v11, %v4363_v46 }
 0x288   : > { %v2615_v26 = vadd.f32 %v4389_v18, %v2592_v21  ;;  %v3122_v51 = vadd.f32 %v3121_v7, %v3120_v20  ;;  %v3083_v21 = vpop.f32.mrf.mxu0  ;;  %v2182_v17 = vadd.f32 %v3070_v50, %v3006_v10  ;;  %v3009_v7 = vadd.f32 %v4337_v35, %v4333_v1 }
 0x289   : > { %v3123_v14 = vpop.f32.mrf.mxu1  ;;  %v3076_v35 = vadd.f32 %v4397_v15, %v4391_v8  ;;  %v3018_v15 = vadd.f32 %v4355_v43, %v4351_v39 }
 0x28a   : > { %2631 = vst [vmem:[%s4394_s8 + $0x10] sm:$0xff] %v2615_v26  ;;  %v2593_v12 = vadd.f32 %v3122_v51, %v2166_v45  ;;  %v3084_v51 = vpop.f32.mrf.mxu0  ;;  %v2187_v13 = vadd.f32 %v3073_v23, %v3009_v7  ;;  %v3030_v23 = vadd.f32 %v4379_v19, %v4375_v9 }
 0x28b   : > { %v3124_v27 = vpop.f32.mrf.mxu1 }
 0x28c   : > { %v2616_v34 = vadd.f32 %v4389_v18, %v2593_v12  ;;  %v3125_v25 = vadd.f32 %v3124_v27, %v3123_v14  ;;  %v3012_v14 = vadd.f32 %v4343_v48, %v4339_v31  ;;  %v3079_v48 = vadd.f32 %v3078_v59, %v4404_v41 }
 0x28d   : > { %v3126_v5 = vpop.f32.mrf.mxu1  ;;  %v3021_v41 = vadd.f32 %v4361_v54, %v4357_v40 }
 0x28e   : > { %2632 = vst [vmem:[%s4394_s8 + $0x18] sm:$0xff] %v2616_v34  ;;  %v2594_v47 = vadd.f32 %v3125_v25, %v2171_v4  ;;  %v3086_v4 = vpop.f32.mrf.mxu0  ;;  %v2190_v37 = vadd.f32 %v3076_v35, %v3012_v14  ;;  %v2195_v8 = vadd.f32 %v3079_v48, %v3015_v57 }
 0x28f   : > { %v3127_v33 = vpop.f32.mrf.mxu1 }
 0x290   : > { %v2617_v52 = vadd.f32 %v4389_v18, %v2594_v47  ;;  %v3128_v36 = vadd.f32 %v3127_v33, %v3126_v5  ;;  %v3087_v16 = vpop.f32.mrf.mxu0 }
 0x291   : > { %v3129_v63 = vpop.f32.mrf.mxu1 }
 0x292   : > { %2633 = vst [vmem:[%s4394_s8 + $0x20] sm:$0xff] %v2617_v52  ;;  %v2595_v44 = vadd.f32 %v3128_v36, %v2174_v30  ;;  %v3089_v52 = vpop.f32.mrf.mxu0 }
 0x293   : > { %v3130_v32 = vpop.f32.mrf.mxu1 }
 0x294   : > { %v2618_v2 = vadd.f32 %v4389_v18, %v2595_v44  ;;  %v3131_v20 = vadd.f32 %v3130_v32, %v3129_v63  ;;  %v2198_v63 = vadd.f32 %v3082_v6, %v3018_v15  ;;  %v3085_v32 = vadd.f32 %v3084_v51, %v3083_v21  ;;  %v3090_v43 = vpop.f32.mrf.mxu0 }
 0x295   : > { %v3132_v29 = vpop.f32.mrf.mxu1  ;;  %v3027_v21 = vadd.f32 %v4373_v3, %v4369_v24 }
 0x296   : > { %2634 = vst [vmem:[%s4394_s8 + $0x28] sm:$0xff] %v2618_v2  ;;  %v2596_v0 = vadd.f32 %v3131_v20, %v2179_v38  ;;  %v2203_v10 = vadd.f32 %v3085_v32, %v3021_v41  ;;  %v3092_v54 = vpop.f32.mrf.mxu0 }
 0x297   : > { %v3133_v42 = vpop.f32.mrf.mxu1 }
 0x298   : > { %v2619_v45 = vadd.f32 %v4389_v18, %v2596_v0  ;;  %v3134_v55 = vadd.f32 %v3133_v42, %v3132_v29  ;;  %v3088_v29 = vadd.f32 %v3087_v16, %v3086_v4  ;;  %v3093_v11 = vpop.f32.mrf.mxu0 }
 0x299   : > { %v3135_v61 = vpop.f32.mrf.mxu1  ;;  %v3094_v3 = vadd.f32 %v3093_v11, %v3092_v54 }
 0x29a   : > { %2635 = vst [vmem:[%s4394_s8 + $0x30] sm:$0xff] %v2619_v45  ;;  %v2597_v26 = vadd.f32 %v3134_v55, %v2182_v17  ;;  %v2206_v0 = vadd.f32 %v3088_v29, %v3024_v22  ;;  %v3091_v45 = vadd.f32 %v3090_v43, %v3089_v52 }
 0x29b   : > { %v3136_v58 = vpop.f32.mrf.mxu1  ;;  %v2214_v14 = vadd.f32 %v3094_v3, %v3030_v23 }
 0x29c   : > { %v2620_v53 = vadd.f32 %v4389_v18, %v2597_v26  ;;  %v3137_v12 = vadd.f32 %v3136_v58, %v3135_v61  ;;  %v2211_v61 = vadd.f32 %v3091_v45, %v3027_v21 }
 0x29d   : > { %v3138_v1 = vpop.f32.mrf.mxu1 }
 0x29e   : > { %2636 = vst [vmem:[%s4394_s8 + $0x38] sm:$0xff] %v2620_v53  ;;  %v2598_v27 = vadd.f32 %v3137_v12, %v2187_v13 }
 0x29f   : > { %v3139_v49 = vpop.f32.mrf.mxu1 }
 0x2a0   : > { %v2621_v34 = vadd.f32 %v4389_v18, %v2598_v27  ;;  %v3140_v25 = vadd.f32 %v3139_v49, %v3138_v1 }
 0x2a1   : > { %v3141_v31 = vpop.f32.mrf.mxu1 }
 0x2a2   : > { %2637 = vst [vmem:[%s4394_s8 + $0x40] sm:$0xff] %v2621_v34  ;;  %v2599_v5 = vadd.f32 %v3140_v25, %v2190_v37 }
 0x2a3   : > { %v3142_v47 = vpop.f32.mrf.mxu1 }
 0x2a4   : > { %v2622_v33 = vadd.f32 %v4389_v18, %v2599_v5  ;;  %v3143_v30 = vadd.f32 %v3142_v47, %v3141_v31 }
 0x2a5   : > { %v3144_v56 = vpop.f32.mrf.mxu1 }
 0x2a6   : > { %2638 = vst [vmem:[%s4394_s8 + $0x48] sm:$0xff] %v2622_v33  ;;  %v2600_v60 = vadd.f32 %v3143_v30, %v2195_v8 }
 0x2a7   : > { %v3145_v36 = vpop.f32.mrf.mxu1 }
 0x2a8   : > { %v2623_v59 = vadd.f32 %v4389_v18, %v2600_v60  ;;  %v3146_v28 = vadd.f32 %v3145_v36, %v3144_v56 }
 0x2a9   : > { %v3147_v44 = vpop.f32.mrf.mxu1 }
 0x2aa   : > { %2639 = vst [vmem:[%s4394_s8 + $0x50] sm:$0xff] %v2623_v59  ;;  %v2601_v39 = vadd.f32 %v3146_v28, %v2198_v63 }
 0x2ab   : > { %v3148_v38 = vpop.f32.mrf.mxu1 }
 0x2ac   : > { %v2624_v62 = vadd.f32 %v4389_v18, %v2601_v39  ;;  %v3149_v2 = vadd.f32 %v3148_v38, %v3147_v44 }
 0x2ad   : > { %v3150_v20 = vpop.f32.mrf.mxu1 }
 0x2ae   : > { %2640 = vst [vmem:[%s4394_s8 + $0x58] sm:$0xff] %v2624_v62  ;;  %v2602_v40 = vadd.f32 %v3149_v2, %v2203_v10 }
 0x2af   : > { %v3151_v50 = vpop.f32.mrf.mxu1 }
 0x2b0   : > { %v2625_v42 = vadd.f32 %v4389_v18, %v2602_v40  ;;  %v3152_v17 = vadd.f32 %v3151_v50, %v3150_v20 }
 0x2b1   : > { %v3153_v7 = vpop.f32.mrf.mxu1 }
 0x2b2   : > { %2641 = vst [vmem:[%s4394_s8 + $0x60] sm:$0xff] %v2625_v42  ;;  %v2603_v46 = vadd.f32 %v3152_v17, %v2206_v0 }
 0x2b3   : > { %v3154_v55 = vpop.f32.mrf.mxu1 }
 0x2b4   : > { %v2626_v26 = vadd.f32 %v4389_v18, %v2603_v46  ;;  %v3155_v51 = vadd.f32 %v3154_v55, %v3153_v7 }
 0x2b5   : > { %v3156_v24 = vpop.f32.mrf.mxu1 }
 0x2b6   : > { %2642 = vst [vmem:[%s4394_s8 + $0x68] sm:$0xff] %v2626_v26  ;;  %v2604_v58 = vadd.f32 %v3155_v51, %v2211_v61 }
 0x2b7   : > { %v3157_v13 = vpop.f32.mrf.mxu1 }
 0x2b8   : > { %v2627_v53 = vadd.f32 %v4389_v18, %v2604_v58  ;;  %v3158_v12 = vadd.f32 %v3157_v13, %v3156_v24 }
 0x2ba   : > { %2643 = vst [vmem:[%s4394_s8 + $0x70] sm:$0xff] %v2627_v53  ;;  %v2605_v1 = vadd.f32 %v3158_v12, %v2214_v14 }
 0x2bc   : > { %v2628_v9 = vadd.f32 %v4389_v18, %v2605_v1 }
 0x2be   : > { %2644 = vst [vmem:[%s4394_s8 + $0x78] sm:$0xff] %v2628_v9 }
 0x2bf   : > { %3354 = shalt.err (!%p3351_p0)
}
 0x2c0   : > { %s3355_s9 = scalar_lea.hbm %s4474_s16, 2048  ;;  %s3359_s6 = scalar_lea.hbm %s4527_s5, 4096 }
 0x2c1   : > { %p3356_p1 = scmp.ne.s32.totalorder %s4474_s16, %s3355_s9  ;;  %p3360_p4 = scmp.lt.s32.totalorder %s4474_s16, %s4527_s5 }
 0x2c2   : > { %p3361_p7 = scmp.lt.s32.totalorder %s3359_s6, %s3355_s9 }
 0x2c3   : > { %p3357_p2 = pnand %p3356_p1, %p3482_p5 }
 0x2c4   : > { %p3362_p6 = por %p3361_p7, %p3360_p4 }
 0x2c5   : > { %p3358_p3 = pneg %p3357_p2 }
 0x2c7   : > { %p3363_p8 = pnand %p3362_p6, %p3358_p3 }
 0x2c9   : > { %3366 = shalt.err (!%p3363_p8)
}
 0x2ca   : > { %s3412_s8 = smov 128   ;;  %s3413_s10 = smov 8  }
 0x2cb   : > { %3163 = dma.vmem_to_hbm [thread:$0]  (%p3482_p5), %s4476_s11, 2048, %s4474_s16, %s4482_s12, %s3412_s8, %s3412_s8, %s3413_s10  }
 0x2cc PF: > { %p3175_p9 = scmp.ge.s32.totalorder %s3405_s21, 2  ;;  %s2674_s13 = sand.u32 1, %s3393_s18  }
 0x2cd   : > { %p4571_p10 = scmp.ne.s32.totalorder %s4533_s29, 0  ;;  %s2675_s14 = scalar_lea.sflag [#allocation6], %s2674_s13 }
 0x2cf   : > { %p3170_p11 = pnand %p3175_p9, %p4571_p10 }
 0x2d1   : > { %p3171_p12 = pneg %p3170_p11 }
 0x2d3   : > { %3388 = dma.done.wait (%p3171_p12), %s2675_s14, 2048  }
 0x2d4   : > { %3390 = vsyncadd (%p3171_p12), %s2675_s14, 4294965248  ;;  %p16_p13 = scmp.ge.s32.totalorder %s3469_s24, 4   ;;  %s4572_s18 = smov %s3397_s19 }
 0x2d5   : > { %s4573_s19 = smov %s3401_s20  ;;  %s4574_s20 = smov %s3480_s27 }
 0x2d6   : > { %s4575_s21 = smov %s3469_s24  ;;  %18 = sbr.rel (!%p16_p13) target bundleno = 4 (0x4), region = 84 }
 0x2db   :  { %2680 = vsyncpa [#allocation5], 1 }
 0x2dc   :  { %2682 = vsyncpa [#allocation5 + $0x1], 1 }
 0x2dd   :  { %2683 = vsyncpa [#allocation6], 1 }
 0x2de   :  { %2685 = vsyncpa [#allocation6 + $0x1], 1 }

</bundles_post_ra>
